<compile_context>
chip_gen: v6e
topology: v6e:2x2x1
jax: 0.10.0
libtpu: 0.0.40
codegen_flags: <defaults>
</compile_context>

<pallas_src>
import jax
import jax.numpy as jnp
from jax.experimental import pallas as pl
from jax.experimental.pallas import tpu as pltpu

# ----------------------------- model config (small) -------------------------
VOCAB_SIZE = 100
MAX_POS = 32
HIDDEN = 32
NUM_HEADS = 2
HEAD_DIM = HIDDEN // NUM_HEADS
INTERMEDIATE = 64
NUM_LAYERS = 2
LN_EPS = 1e-12

_VMEM_SPEC = pl.BlockSpec(memory_space=pltpu.MemorySpace.VMEM)


# ----------------------------- fused encoder kernel --------------------------
def _encoder_kernel(
    emb_ref,        # [B*S, H]  f32   word+pos+tok embedding sum
    mask_ref,       # [B, 1, S] f32   additive mask (0 / -10000)
    eg_ref, eb_ref, # [1, H]    f32   embedding LayerNorm gamma/beta
    wqkv_ref,       # [L, H, 3H]   bf16  fused Q|K|V weight
    bqkv_ref,       # [L, 1, 3H]   f32
    wo_ref,         # [L, H, H]    bf16
    bo_ref,         # [L, 1, H]    f32
    g1_ref, b1_ref, # [L, 1, H]    f32   post-attention LayerNorm
    wi_ref,         # [L, H, I]    bf16
    bi_ref,         # [L, 1, I]    f32
    wf_ref,         # [L, I, H]    bf16
    bf_ref,         # [L, 1, H]    f32
    g2_ref, b2_ref, # [L, 1, H]    f32   post-FFN LayerNorm
    cls_ref,        # [B, H]    f32   output: last_hidden_state[:, 0, :]
):
    B = mask_ref.shape[0]
    S = mask_ref.shape[2]
    H = emb_ref.shape[1]
    scale = 1.0 / (HEAD_DIM ** 0.5)

    def layer_norm(x, g, b):
        mu = jnp.mean(x, axis=-1, keepdims=True)
        var = jnp.mean((x - mu) * (x - mu), axis=-1, keepdims=True)
        return (x - mu) * jax.lax.rsqrt(var + LN_EPS) * g + b

    def gelu(x):
        # TODO(synk): PyTorch/HF BERT uses exact-erf GELU; tanh approximation
        #             differs by ~1e-3 (no erf lowering relied on here).
        return 0.5 * x * (1.0 + jnp.tanh(
            0.7978845608028654 * (x + 0.044715 * x * x * x)))

    add_mask = mask_ref[...]                                   # [B, 1, S]
    x = layer_norm(emb_ref[...], eg_ref[...], eb_ref[...])     # [B*S, H] f32

    # static unroll over layers: weights read from the stacked refs at
    # compile-time-constant leading indices.
    for l in range(NUM_LAYERS):
        # ---- fused QKV projection (bf16 operands, f32 accumulate) ----
        qkv = jnp.dot(x.astype(jnp.bfloat16), wqkv_ref[l],
                      preferred_element_type=jnp.float32) + bqkv_ref[l]  # [B*S, 3H]

        # ---- multi-head attention, heads handled in-kernel ----
        attn_out = jnp.zeros((B * S, H), jnp.float32)
        for h in range(NUM_HEADS):
            off = h * HEAD_DIM
            q_h = (qkv[:, off:off + HEAD_DIM] * scale).reshape(B, S, HEAD_DIM)
            k_h = qkv[:, H + off:H + off + HEAD_DIM].reshape(B, S, HEAD_DIM)
            v_h = qkv[:, 2 * H + off:2 * H + off + HEAD_DIM].reshape(B, S, HEAD_DIM)

            s = jnp.einsum("bqd,bkd->bqk",
                           q_h.astype(jnp.bfloat16), k_h.astype(jnp.bfloat16),
                           preferred_element_type=jnp.float32)            # [B,S,S]
            s = s + add_mask
            s = s - jnp.max(s, axis=-1, keepdims=True)
            p = jnp.exp(s)
            p = p * pl.reciprocal(jnp.sum(p, axis=-1, keepdims=True), approx=True)

            ctx_h = jnp.einsum("bqk,bkd->bqd",
                               p.astype(jnp.bfloat16), v_h.astype(jnp.bfloat16),
                               preferred_element_type=jnp.float32)        # [B,S,Dh]

            # head merge folded into per-head row-slices of Wo:
            #   concat_h(ctx_h) @ Wo == sum_h ctx_h @ Wo[h*Dh:(h+1)*Dh, :]
            attn_out = attn_out + jnp.dot(
                ctx_h.reshape(B * S, HEAD_DIM).astype(jnp.bfloat16),
                wo_ref[l, off:off + HEAD_DIM, :],
                preferred_element_type=jnp.float32)

        attn_out = attn_out + bo_ref[l]
        x = layer_norm(x + attn_out, g1_ref[l], b1_ref[l])

        # ---- feed-forward (GELU) + residual + LayerNorm ----
        inter = jnp.dot(x.astype(jnp.bfloat16), wi_ref[l],
                        preferred_element_type=jnp.float32) + bi_ref[l]
        inter = gelu(inter)
        ffn = jnp.dot(inter.astype(jnp.bfloat16), wf_ref[l],
                      preferred_element_type=jnp.float32) + bf_ref[l]
        x = layer_norm(x + ffn, g2_ref[l], b2_ref[l])

    # cls_embedding = last_hidden_state[:, 0, :]  (only CLS rows leave VMEM)
    cls_ref[...] = x.reshape(B, S, H)[:, 0, :].astype(cls_ref.dtype)


# ----------------------------- parameter init --------------------------------
def init_params(key):
    def nrm(k, shape, std=0.02):
        return (std * jax.random.normal(k, shape)).astype(jnp.float32)

    keys = iter(jax.random.split(key, 3 + NUM_LAYERS * 6))
    params = {
        "word_emb": nrm(next(keys), (VOCAB_SIZE, HIDDEN)),
        "pos_emb": nrm(next(keys), (MAX_POS, HIDDEN)),
        "tok_emb": nrm(next(keys), (2, HIDDEN)),
        "emb_ln_g": jnp.ones((1, HIDDEN), jnp.float32),
        "emb_ln_b": jnp.zeros((1, HIDDEN), jnp.float32),
    }

    wqkv, bqkv, wo, bo = [], [], [], []
    g1, b1, wi, bi, wf, bf, g2, b2 = [], [], [], [], [], [], [], []
    for _ in range(NUM_LAYERS):
        Wq = nrm(next(keys), (HIDDEN, HIDDEN))
        Wk = nrm(next(keys), (HIDDEN, HIDDEN))
        Wv = nrm(next(keys), (HIDDEN, HIDDEN))
        wqkv.append(jnp.concatenate([Wq, Wk, Wv], axis=1))        # [H, 3H]
        bqkv.append(jnp.zeros((1, 3 * HIDDEN), jnp.float32))
        wo.append(nrm(next(keys), (HIDDEN, HIDDEN)))
        bo.append(jnp.zeros((1, HIDDEN), jnp.float32))
        g1.append(jnp.ones((1, HIDDEN), jnp.float32))
        b1.append(jnp.zeros((1, HIDDEN), jnp.float32))
        wi.append(nrm(next(keys), (HIDDEN, INTERMEDIATE)))
        bi.append(jnp.zeros((1, INTERMEDIATE), jnp.float32))
        wf.append(nrm(next(keys), (INTERMEDIATE, HIDDEN)))
        bf.append(jnp.zeros((1, HIDDEN), jnp.float32))
        g2.append(jnp.ones((1, HIDDEN), jnp.float32))
        b2.append(jnp.zeros((1, HIDDEN), jnp.float32))

    # matmul weights in bf16 (f32 accumulation in-kernel); bias/LN params f32
    params["stacked"] = {
        "wqkv": jnp.stack(wqkv).astype(jnp.bfloat16),
        "bqkv": jnp.stack(bqkv),
        "wo": jnp.stack(wo).astype(jnp.bfloat16),
        "bo": jnp.stack(bo),
        "ln1_g": jnp.stack(g1), "ln1_b": jnp.stack(b1),
        "wi": jnp.stack(wi).astype(jnp.bfloat16),
        "bi": jnp.stack(bi),
        "wf": jnp.stack(wf).astype(jnp.bfloat16),
        "bf": jnp.stack(bf),
        "ln2_g": jnp.stack(g2), "ln2_b": jnp.stack(b2),
    }
    return params


# ----------------------------- forward pass ----------------------------------
def bioclinicalbert_ft_forward(params, input_ids, attention_mask):
    """Equivalent of BioClinicalBERT_FT.forward: returns CLS embedding [B, H]."""
    B, S = input_ids.shape

    # --- embedding lookup (plain-JAX glue; gather has no tidy BlockSpec form) ---
    # TODO(synk): embedding gather stays in XLA (jnp.take); a Pallas DMA-gather
    #             is only worthwhile at real vocab/seq sizes.
    word = jnp.take(params["word_emb"], input_ids, axis=0)          # [B, S, H]
    pos = params["pos_emb"][:S][None, :, :]                         # [1, S, H]
    tok = params["tok_emb"][0][None, None, :]                       # token_type_ids = 0
    emb = (word + pos + tok).astype(jnp.float32).reshape(B * S, HIDDEN)

    # --- extended additive attention mask: (1 - m) * -10000, [B, 1, S] ---
    add_mask = ((1.0 - attention_mask.astype(jnp.float32)) * -10000.0)[:, None, :]

    stk = params["stacked"]
    cls = pl.pallas_call(
        _encoder_kernel,
        out_shape=jax.ShapeDtypeStruct((B, HIDDEN), jnp.float32),
        in_specs=[_VMEM_SPEC] * 16,
        out_specs=_VMEM_SPEC,
    )(emb, add_mask, params["emb_ln_g"], params["emb_ln_b"],
      stk["wqkv"], stk["bqkv"], stk["wo"], stk["bo"],
      stk["ln1_g"], stk["ln1_b"],
      stk["wi"], stk["bi"], stk["wf"], stk["bf"],
      stk["ln2_g"], stk["ln2_b"])

    return cls


# ----------------------------- main ------------------------------------------
if __name__ == "__main__":
    key = jax.random.PRNGKey(0)
    pkey, ikey = jax.random.split(key)

    params = init_params(pkey)

    B, S = 2, 8
    input_ids = jax.random.randint(ikey, (B, S), 0, VOCAB_SIZE, dtype=jnp.int32)
    # batch element 1 has its last 2 tokens padded out
    attention_mask = jnp.array(
        [[1, 1, 1, 1, 1, 1, 1, 1],
         [1, 1, 1, 1, 1, 1, 0, 0]], dtype=jnp.int32)

    forward = jax.jit(bioclinicalbert_ft_forward)
    cls = forward(params, input_ids, attention_mask)
    cls = jax.block_until_ready(cls)

    assert cls.shape == (B, HIDDEN) and cls.dtype == jnp.float32
    assert bool(jnp.all(jnp.isfinite(cls)))
    print("KERNEL_OK")
</pallas_src>

<mosaic_0001>
module attributes {stable_mosaic.version = 11 : i64} {
  func.func @_encoder_kernel(%arg0: memref<16x32xf32, #tpu.memory_space<vmem>>, %arg1: memref<2x1x8xf32, #tpu.memory_space<vmem>>, %arg2: memref<1x32xf32, #tpu.memory_space<vmem>>, %arg3: memref<1x32xf32, #tpu.memory_space<vmem>>, %arg4: memref<2x32x96xbf16, #tpu.memory_space<vmem>>, %arg5: memref<2x1x96xf32, #tpu.memory_space<vmem>>, %arg6: memref<2x32x32xbf16, #tpu.memory_space<vmem>>, %arg7: memref<2x1x32xf32, #tpu.memory_space<vmem>>, %arg8: memref<2x1x32xf32, #tpu.memory_space<vmem>>, %arg9: memref<2x1x32xf32, #tpu.memory_space<vmem>>, %arg10: memref<2x32x64xbf16, #tpu.memory_space<vmem>>, %arg11: memref<2x1x64xf32, #tpu.memory_space<vmem>>, %arg12: memref<2x64x32xbf16, #tpu.memory_space<vmem>>, %arg13: memref<2x1x32xf32, #tpu.memory_space<vmem>>, %arg14: memref<2x1x32xf32, #tpu.memory_space<vmem>>, %arg15: memref<2x1x32xf32, #tpu.memory_space<vmem>>, %arg16: memref<2x32xf32, #tpu.memory_space<vmem>>) attributes {dimension_semantics = [], scalar_prefetch = 0 : i64, scratch_operands = 0 : i64, tpu.core_type = #tpu.core_type<tc>} {
    %c0 = arith.constant 0 : index
    %c0_0 = arith.constant 0 : index
    %c0_1 = arith.constant 0 : index
    %0 = vector.load %arg1[%c0, %c0_0, %c0_1] : memref<2x1x8xf32, #tpu.memory_space<vmem>>, vector<2x1x8xf32>
    %c0_2 = arith.constant 0 : index
    %c0_3 = arith.constant 0 : index
    %1 = vector.load %arg0[%c0_2, %c0_3] : memref<16x32xf32, #tpu.memory_space<vmem>>, vector<16x32xf32>
    %c0_4 = arith.constant 0 : index
    %c0_5 = arith.constant 0 : index
    %2 = vector.load %arg2[%c0_4, %c0_5] : memref<1x32xf32, #tpu.memory_space<vmem>>, vector<1x32xf32>
    %c0_6 = arith.constant 0 : index
    %c0_7 = arith.constant 0 : index
    %3 = vector.load %arg3[%c0_6, %c0_7] : memref<1x32xf32, #tpu.memory_space<vmem>>, vector<1x32xf32>
    %cst = arith.constant dense<0.000000e+00> : vector<16xf32>
    %4 = vector.multi_reduction <add>, %1, %cst [1] : vector<16x32xf32> to vector<16xf32>
    %5 = vector.shape_cast %4 : vector<16xf32> to vector<16x1xf32>
    %cst_8 = arith.constant 3.200000e+01 : f32
    %6 = vector.broadcast %cst_8 : f32 to vector<16x1xf32>
    %7 = arith.divf %5, %6 : vector<16x1xf32>
    %8 = vector.broadcast %7 : vector<16x1xf32> to vector<16x32xf32>
    %9 = arith.subf %1, %8 : vector<16x32xf32>
    %10 = vector.broadcast %7 : vector<16x1xf32> to vector<16x32xf32>
    %11 = arith.subf %1, %10 : vector<16x32xf32>
    %12 = arith.mulf %9, %11 : vector<16x32xf32>
    %cst_9 = arith.constant dense<0.000000e+00> : vector<16xf32>
    %13 = vector.multi_reduction <add>, %12, %cst_9 [1] : vector<16x32xf32> to vector<16xf32>
    %14 = vector.shape_cast %13 : vector<16xf32> to vector<16x1xf32>
    %cst_10 = arith.constant 3.200000e+01 : f32
    %15 = vector.broadcast %cst_10 : f32 to vector<16x1xf32>
    %16 = arith.divf %14, %15 : vector<16x1xf32>
    %17 = vector.broadcast %7 : vector<16x1xf32> to vector<16x32xf32>
    %18 = arith.subf %1, %17 : vector<16x32xf32>
    %cst_11 = arith.constant 9.99999996E-13 : f32
    %19 = vector.broadcast %cst_11 : f32 to vector<16x1xf32>
    %20 = arith.addf %16, %19 : vector<16x1xf32>
    %21 = math.rsqrt %20 : vector<16x1xf32>
    %22 = vector.broadcast %21 : vector<16x1xf32> to vector<16x32xf32>
    %23 = arith.mulf %18, %22 : vector<16x32xf32>
    %24 = vector.broadcast %2 : vector<1x32xf32> to vector<16x32xf32>
    %25 = arith.mulf %23, %24 : vector<16x32xf32>
    %26 = vector.broadcast %3 : vector<1x32xf32> to vector<16x32xf32>
    %27 = arith.addf %25, %26 : vector<16x32xf32>
    %28 = arith.truncf %27 : vector<16x32xf32> to vector<16x32xbf16>
    %c0_12 = arith.constant 0 : index
    %c0_13 = arith.constant 0 : index
    %c0_14 = arith.constant 0 : index
    %29 = vector.load %arg4[%c0_12, %c0_13, %c0_14] : memref<2x32x96xbf16, #tpu.memory_space<vmem>>, vector<1x32x96xbf16>
    %30 = vector.shape_cast %29 : vector<1x32x96xbf16> to vector<32x96xbf16>
    %cst_15 = arith.constant dense<0.000000e+00> : vector<16x96xf32>
    %31 = tpu.matmul %28, %30, %cst_15 {dimension_numbers = #tpu.dot_dimension_numbers<[1], [0], [0], [1], [0, 0, 1, 1], [], []>} : vector<16x32xbf16>, vector<32x96xbf16>, vector<16x96xf32> -> vector<16x96xf32>
    %c0_16 = arith.constant 0 : index
    %c0_17 = arith.constant 0 : index
    %c0_18 = arith.constant 0 : index
    %32 = vector.load %arg5[%c0_16, %c0_17, %c0_18] : memref<2x1x96xf32, #tpu.memory_space<vmem>>, vector<1x1x96xf32>
    %33 = vector.shape_cast %32 : vector<1x1x96xf32> to vector<1x96xf32>
    %34 = vector.broadcast %33 : vector<1x96xf32> to vector<16x96xf32>
    %35 = arith.addf %31, %34 : vector<16x96xf32>
    %cst_19 = arith.constant 0.000000e+00 : f32
    %36 = vector.broadcast %cst_19 : f32 to vector<16x32xf32>
    %37 = vector.extract_strided_slice %35 {offsets = [0, 0], sizes = [16, 16], strides = [1, 1]} : vector<16x96xf32> to vector<16x16xf32>
    %cst_20 = arith.constant 2.500000e-01 : f32
    %38 = vector.broadcast %cst_20 : f32 to vector<16x16xf32>
    %39 = arith.mulf %37, %38 : vector<16x16xf32>
    %40 = vector.shape_cast %39 : vector<16x16xf32> to vector<2x8x16xf32>
    %41 = vector.extract_strided_slice %35 {offsets = [0, 32], sizes = [16, 16], strides = [1, 1]} : vector<16x96xf32> to vector<16x16xf32>
    %42 = vector.shape_cast %41 : vector<16x16xf32> to vector<2x8x16xf32>
    %43 = vector.extract_strided_slice %35 {offsets = [0, 64], sizes = [16, 16], strides = [1, 1]} : vector<16x96xf32> to vector<16x16xf32>
    %44 = vector.shape_cast %43 : vector<16x16xf32> to vector<2x8x16xf32>
    %45 = arith.truncf %40 : vector<2x8x16xf32> to vector<2x8x16xbf16>
    %46 = arith.truncf %42 : vector<2x8x16xf32> to vector<2x8x16xbf16>
    "tpu.trace_start"() <{level = 10 : i32, message = "bqd,bkd->bqk"}> : () -> ()
    %cst_21 = arith.constant dense<0.000000e+00> : vector<2x8x8xf32>
    %47 = tpu.matmul %45, %46, %cst_21 {dimension_numbers = #tpu.dot_dimension_numbers<[2], [2], [1], [1], [0, 0, 0, 1, 1, 1], [0], [0]>} : vector<2x8x16xbf16>, vector<2x8x16xbf16>, vector<2x8x8xf32> -> vector<2x8x8xf32>
    "tpu.trace_stop"() : () -> ()
    %48 = vector.broadcast %0 : vector<2x1x8xf32> to vector<2x8x8xf32>
    %49 = arith.addf %47, %48 : vector<2x8x8xf32>
    %cst_22 = arith.constant dense<0xFF800000> : vector<2x8xf32>
    %50 = vector.multi_reduction <maximumf>, %49, %cst_22 [2] : vector<2x8x8xf32> to vector<2x8xf32>
    %51 = vector.shape_cast %50 : vector<2x8xf32> to vector<2x8x1xf32>
    %52 = vector.broadcast %51 : vector<2x8x1xf32> to vector<2x8x8xf32>
    %53 = arith.subf %49, %52 : vector<2x8x8xf32>
    %54 = math.exp %53 : vector<2x8x8xf32>
    %cst_23 = arith.constant dense<0.000000e+00> : vector<2x8xf32>
    %55 = vector.multi_reduction <add>, %54, %cst_23 [2] : vector<2x8x8xf32> to vector<2x8xf32>
    %56 = vector.shape_cast %55 : vector<2x8xf32> to vector<2x8x1xf32>
    %57 = tpu.reciprocal %56 {approx = true} : vector<2x8x1xf32> -> vector<2x8x1xf32>
    %58 = vector.broadcast %57 : vector<2x8x1xf32> to vector<2x8x8xf32>
    %59 = arith.mulf %54, %58 : vector<2x8x8xf32>
    %60 = arith.truncf %59 : vector<2x8x8xf32> to vector<2x8x8xbf16>
    %61 = arith.truncf %44 : vector<2x8x16xf32> to vector<2x8x16xbf16>
    "tpu.trace_start"() <{level = 10 : i32, message = "bqk,bkd->bqd"}> : () -> ()
    %cst_24 = arith.constant dense<0.000000e+00> : vector<2x8x16xf32>
    %62 = tpu.matmul %60, %61, %cst_24 {dimension_numbers = #tpu.dot_dimension_numbers<[2], [1], [1], [2], [0, 0, 0, 1, 1, 2], [0], [0]>} : vector<2x8x8xbf16>, vector<2x8x16xbf16>, vector<2x8x16xf32> -> vector<2x8x16xf32>
    "tpu.trace_stop"() : () -> ()
    %63 = vector.shape_cast %62 : vector<2x8x16xf32> to vector<16x16xf32>
    %64 = arith.truncf %63 : vector<16x16xf32> to vector<16x16xbf16>
    %c0_25 = arith.constant 0 : index
    %c0_26 = arith.constant 0 : index
    %c0_27 = arith.constant 0 : index
    %65 = vector.load %arg6[%c0_25, %c0_26, %c0_27] : memref<2x32x32xbf16, #tpu.memory_space<vmem>>, vector<1x16x32xbf16>
    %66 = vector.shape_cast %65 : vector<1x16x32xbf16> to vector<16x32xbf16>
    %cst_28 = arith.constant dense<0.000000e+00> : vector<16x32xf32>
    %67 = tpu.matmul %64, %66, %cst_28 {dimension_numbers = #tpu.dot_dimension_numbers<[1], [0], [0], [1], [0, 0, 1, 1], [], []>} : vector<16x16xbf16>, vector<16x32xbf16>, vector<16x32xf32> -> vector<16x32xf32>
    %68 = arith.addf %36, %67 : vector<16x32xf32>
    %69 = vector.extract_strided_slice %35 {offsets = [0, 16], sizes = [16, 16], strides = [1, 1]} : vector<16x96xf32> to vector<16x16xf32>
    %cst_29 = arith.constant 2.500000e-01 : f32
    %70 = vector.broadcast %cst_29 : f32 to vector<16x16xf32>
    %71 = arith.mulf %69, %70 : vector<16x16xf32>
    %72 = vector.shape_cast %71 : vector<16x16xf32> to vector<2x8x16xf32>
    %73 = vector.extract_strided_slice %35 {offsets = [0, 48], sizes = [16, 16], strides = [1, 1]} : vector<16x96xf32> to vector<16x16xf32>
    %74 = vector.shape_cast %73 : vector<16x16xf32> to vector<2x8x16xf32>
    %75 = vector.extract_strided_slice %35 {offsets = [0, 80], sizes = [16, 16], strides = [1, 1]} : vector<16x96xf32> to vector<16x16xf32>
    %76 = vector.shape_cast %75 : vector<16x16xf32> to vector<2x8x16xf32>
    %77 = arith.truncf %72 : vector<2x8x16xf32> to vector<2x8x16xbf16>
    %78 = arith.truncf %74 : vector<2x8x16xf32> to vector<2x8x16xbf16>
    "tpu.trace_start"() <{level = 10 : i32, message = "bqd,bkd->bqk"}> : () -> ()
    %cst_30 = arith.constant dense<0.000000e+00> : vector<2x8x8xf32>
    %79 = tpu.matmul %77, %78, %cst_30 {dimension_numbers = #tpu.dot_dimension_numbers<[2], [2], [1], [1], [0, 0, 0, 1, 1, 1], [0], [0]>} : vector<2x8x16xbf16>, vector<2x8x16xbf16>, vector<2x8x8xf32> -> vector<2x8x8xf32>
    "tpu.trace_stop"() : () -> ()
    %80 = vector.broadcast %0 : vector<2x1x8xf32> to vector<2x8x8xf32>
    %81 = arith.addf %79, %80 : vector<2x8x8xf32>
    %cst_31 = arith.constant dense<0xFF800000> : vector<2x8xf32>
    %82 = vector.multi_reduction <maximumf>, %81, %cst_31 [2] : vector<2x8x8xf32> to vector<2x8xf32>
    %83 = vector.shape_cast %82 : vector<2x8xf32> to vector<2x8x1xf32>
    %84 = vector.broadcast %83 : vector<2x8x1xf32> to vector<2x8x8xf32>
    %85 = arith.subf %81, %84 : vector<2x8x8xf32>
    %86 = math.exp %85 : vector<2x8x8xf32>
    %cst_32 = arith.constant dense<0.000000e+00> : vector<2x8xf32>
    %87 = vector.multi_reduction <add>, %86, %cst_32 [2] : vector<2x8x8xf32> to vector<2x8xf32>
    %88 = vector.shape_cast %87 : vector<2x8xf32> to vector<2x8x1xf32>
    %89 = tpu.reciprocal %88 {approx = true} : vector<2x8x1xf32> -> vector<2x8x1xf32>
    %90 = vector.broadcast %89 : vector<2x8x1xf32> to vector<2x8x8xf32>
    %91 = arith.mulf %86, %90 : vector<2x8x8xf32>
    %92 = arith.truncf %91 : vector<2x8x8xf32> to vector<2x8x8xbf16>
    %93 = arith.truncf %76 : vector<2x8x16xf32> to vector<2x8x16xbf16>
    "tpu.trace_start"() <{level = 10 : i32, message = "bqk,bkd->bqd"}> : () -> ()
    %cst_33 = arith.constant dense<0.000000e+00> : vector<2x8x16xf32>
    %94 = tpu.matmul %92, %93, %cst_33 {dimension_numbers = #tpu.dot_dimension_numbers<[2], [1], [1], [2], [0, 0, 0, 1, 1, 2], [0], [0]>} : vector<2x8x8xbf16>, vector<2x8x16xbf16>, vector<2x8x16xf32> -> vector<2x8x16xf32>
    "tpu.trace_stop"() : () -> ()
    %95 = vector.shape_cast %94 : vector<2x8x16xf32> to vector<16x16xf32>
    %96 = arith.truncf %95 : vector<16x16xf32> to vector<16x16xbf16>
    %c0_34 = arith.constant 0 : index
    %c16 = arith.constant 16 : index
    %c0_35 = arith.constant 0 : index
    %97 = vector.load %arg6[%c0_34, %c16, %c0_35] : memref<2x32x32xbf16, #tpu.memory_space<vmem>>, vector<1x16x32xbf16>
    %98 = vector.shape_cast %97 : vector<1x16x32xbf16> to vector<16x32xbf16>
    %cst_36 = arith.constant dense<0.000000e+00> : vector<16x32xf32>
    %99 = tpu.matmul %96, %98, %cst_36 {dimension_numbers = #tpu.dot_dimension_numbers<[1], [0], [0], [1], [0, 0, 1, 1], [], []>} : vector<16x16xbf16>, vector<16x32xbf16>, vector<16x32xf32> -> vector<16x32xf32>
    %100 = arith.addf %68, %99 : vector<16x32xf32>
    %c0_37 = arith.constant 0 : index
    %c0_38 = arith.constant 0 : index
    %c0_39 = arith.constant 0 : index
    %101 = vector.load %arg7[%c0_37, %c0_38, %c0_39] : memref<2x1x32xf32, #tpu.memory_space<vmem>>, vector<1x1x32xf32>
    %102 = vector.shape_cast %101 : vector<1x1x32xf32> to vector<1x32xf32>
    %103 = vector.broadcast %102 : vector<1x32xf32> to vector<16x32xf32>
    %104 = arith.addf %100, %103 : vector<16x32xf32>
    %105 = arith.addf %27, %104 : vector<16x32xf32>
    %c0_40 = arith.constant 0 : index
    %c0_41 = arith.constant 0 : index
    %c0_42 = arith.constant 0 : index
    %106 = vector.load %arg8[%c0_40, %c0_41, %c0_42] : memref<2x1x32xf32, #tpu.memory_space<vmem>>, vector<1x1x32xf32>
    %107 = vector.shape_cast %106 : vector<1x1x32xf32> to vector<1x32xf32>
    %c0_43 = arith.constant 0 : index
    %c0_44 = arith.constant 0 : index
    %c0_45 = arith.constant 0 : index
    %108 = vector.load %arg9[%c0_43, %c0_44, %c0_45] : memref<2x1x32xf32, #tpu.memory_space<vmem>>, vector<1x1x32xf32>
    %109 = vector.shape_cast %108 : vector<1x1x32xf32> to vector<1x32xf32>
    %cst_46 = arith.constant dense<0.000000e+00> : vector<16xf32>
    %110 = vector.multi_reduction <add>, %105, %cst_46 [1] : vector<16x32xf32> to vector<16xf32>
    %111 = vector.shape_cast %110 : vector<16xf32> to vector<16x1xf32>
    %cst_47 = arith.constant 3.200000e+01 : f32
    %112 = vector.broadcast %cst_47 : f32 to vector<16x1xf32>
    %113 = arith.divf %111, %112 : vector<16x1xf32>
    %114 = vector.broadcast %113 : vector<16x1xf32> to vector<16x32xf32>
    %115 = arith.subf %105, %114 : vector<16x32xf32>
    %116 = vector.broadcast %113 : vector<16x1xf32> to vector<16x32xf32>
    %117 = arith.subf %105, %116 : vector<16x32xf32>
    %118 = arith.mulf %115, %117 : vector<16x32xf32>
    %cst_48 = arith.constant dense<0.000000e+00> : vector<16xf32>
    %119 = vector.multi_reduction <add>, %118, %cst_48 [1] : vector<16x32xf32> to vector<16xf32>
    %120 = vector.shape_cast %119 : vector<16xf32> to vector<16x1xf32>
    %cst_49 = arith.constant 3.200000e+01 : f32
    %121 = vector.broadcast %cst_49 : f32 to vector<16x1xf32>
    %122 = arith.divf %120, %121 : vector<16x1xf32>
    %123 = vector.broadcast %113 : vector<16x1xf32> to vector<16x32xf32>
    %124 = arith.subf %105, %123 : vector<16x32xf32>
    %cst_50 = arith.constant 9.99999996E-13 : f32
    %125 = vector.broadcast %cst_50 : f32 to vector<16x1xf32>
    %126 = arith.addf %122, %125 : vector<16x1xf32>
    %127 = math.rsqrt %126 : vector<16x1xf32>
    %128 = vector.broadcast %127 : vector<16x1xf32> to vector<16x32xf32>
    %129 = arith.mulf %124, %128 : vector<16x32xf32>
    %130 = vector.broadcast %107 : vector<1x32xf32> to vector<16x32xf32>
    %131 = arith.mulf %129, %130 : vector<16x32xf32>
    %132 = vector.broadcast %109 : vector<1x32xf32> to vector<16x32xf32>
    %133 = arith.addf %131, %132 : vector<16x32xf32>
    %134 = arith.truncf %133 : vector<16x32xf32> to vector<16x32xbf16>
    %c0_51 = arith.constant 0 : index
    %c0_52 = arith.constant 0 : index
    %c0_53 = arith.constant 0 : index
    %135 = vector.load %arg10[%c0_51, %c0_52, %c0_53] : memref<2x32x64xbf16, #tpu.memory_space<vmem>>, vector<1x32x64xbf16>
    %136 = vector.shape_cast %135 : vector<1x32x64xbf16> to vector<32x64xbf16>
    %cst_54 = arith.constant dense<0.000000e+00> : vector<16x64xf32>
    %137 = tpu.matmul %134, %136, %cst_54 {dimension_numbers = #tpu.dot_dimension_numbers<[1], [0], [0], [1], [0, 0, 1, 1], [], []>} : vector<16x32xbf16>, vector<32x64xbf16>, vector<16x64xf32> -> vector<16x64xf32>
    %c0_55 = arith.constant 0 : index
    %c0_56 = arith.constant 0 : index
    %c0_57 = arith.constant 0 : index
    %138 = vector.load %arg11[%c0_55, %c0_56, %c0_57] : memref<2x1x64xf32, #tpu.memory_space<vmem>>, vector<1x1x64xf32>
    %139 = vector.shape_cast %138 : vector<1x1x64xf32> to vector<1x64xf32>
    %140 = vector.broadcast %139 : vector<1x64xf32> to vector<16x64xf32>
    %141 = arith.addf %137, %140 : vector<16x64xf32>
    %cst_58 = arith.constant 5.000000e-01 : f32
    %142 = vector.broadcast %cst_58 : f32 to vector<16x64xf32>
    %143 = arith.mulf %142, %141 : vector<16x64xf32>
    %cst_59 = arith.constant 4.471500e-02 : f32
    %144 = vector.broadcast %cst_59 : f32 to vector<16x64xf32>
    %145 = arith.mulf %144, %141 : vector<16x64xf32>
    %146 = arith.mulf %145, %141 : vector<16x64xf32>
    %147 = arith.mulf %146, %141 : vector<16x64xf32>
    %148 = arith.addf %141, %147 : vector<16x64xf32>
    %cst_60 = arith.constant 0.797884583 : f32
    %149 = vector.broadcast %cst_60 : f32 to vector<16x64xf32>
    %150 = arith.mulf %149, %148 : vector<16x64xf32>
    %151 = math.tanh %150 : vector<16x64xf32>
    %cst_61 = arith.constant 1.000000e+00 : f32
    %152 = vector.broadcast %cst_61 : f32 to vector<16x64xf32>
    %153 = arith.addf %152, %151 : vector<16x64xf32>
    %154 = arith.mulf %143, %153 : vector<16x64xf32>
    %155 = arith.truncf %154 : vector<16x64xf32> to vector<16x64xbf16>
    %c0_62 = arith.constant 0 : index
    %c0_63 = arith.constant 0 : index
    %c0_64 = arith.constant 0 : index
    %156 = vector.load %arg12[%c0_62, %c0_63, %c0_64] : memref<2x64x32xbf16, #tpu.memory_space<vmem>>, vector<1x64x32xbf16>
    %157 = vector.shape_cast %156 : vector<1x64x32xbf16> to vector<64x32xbf16>
    %cst_65 = arith.constant dense<0.000000e+00> : vector<16x32xf32>
    %158 = tpu.matmul %155, %157, %cst_65 {dimension_numbers = #tpu.dot_dimension_numbers<[1], [0], [0], [1], [0, 0, 1, 1], [], []>} : vector<16x64xbf16>, vector<64x32xbf16>, vector<16x32xf32> -> vector<16x32xf32>
    %c0_66 = arith.constant 0 : index
    %c0_67 = arith.constant 0 : index
    %c0_68 = arith.constant 0 : index
    %159 = vector.load %arg13[%c0_66, %c0_67, %c0_68] : memref<2x1x32xf32, #tpu.memory_space<vmem>>, vector<1x1x32xf32>
    %160 = vector.shape_cast %159 : vector<1x1x32xf32> to vector<1x32xf32>
    %161 = vector.broadcast %160 : vector<1x32xf32> to vector<16x32xf32>
    %162 = arith.addf %158, %161 : vector<16x32xf32>
    %163 = arith.addf %133, %162 : vector<16x32xf32>
    %c0_69 = arith.constant 0 : index
    %c0_70 = arith.constant 0 : index
    %c0_71 = arith.constant 0 : index
    %164 = vector.load %arg14[%c0_69, %c0_70, %c0_71] : memref<2x1x32xf32, #tpu.memory_space<vmem>>, vector<1x1x32xf32>
    %165 = vector.shape_cast %164 : vector<1x1x32xf32> to vector<1x32xf32>
    %c0_72 = arith.constant 0 : index
    %c0_73 = arith.constant 0 : index
    %c0_74 = arith.constant 0 : index
    %166 = vector.load %arg15[%c0_72, %c0_73, %c0_74] : memref<2x1x32xf32, #tpu.memory_space<vmem>>, vector<1x1x32xf32>
    %167 = vector.shape_cast %166 : vector<1x1x32xf32> to vector<1x32xf32>
    %cst_75 = arith.constant dense<0.000000e+00> : vector<16xf32>
    %168 = vector.multi_reduction <add>, %163, %cst_75 [1] : vector<16x32xf32> to vector<16xf32>
    %169 = vector.shape_cast %168 : vector<16xf32> to vector<16x1xf32>
    %cst_76 = arith.constant 3.200000e+01 : f32
    %170 = vector.broadcast %cst_76 : f32 to vector<16x1xf32>
    %171 = arith.divf %169, %170 : vector<16x1xf32>
    %172 = vector.broadcast %171 : vector<16x1xf32> to vector<16x32xf32>
    %173 = arith.subf %163, %172 : vector<16x32xf32>
    %174 = vector.broadcast %171 : vector<16x1xf32> to vector<16x32xf32>
    %175 = arith.subf %163, %174 : vector<16x32xf32>
    %176 = arith.mulf %173, %175 : vector<16x32xf32>
    %cst_77 = arith.constant dense<0.000000e+00> : vector<16xf32>
    %177 = vector.multi_reduction <add>, %176, %cst_77 [1] : vector<16x32xf32> to vector<16xf32>
    %178 = vector.shape_cast %177 : vector<16xf32> to vector<16x1xf32>
    %cst_78 = arith.constant 3.200000e+01 : f32
    %179 = vector.broadcast %cst_78 : f32 to vector<16x1xf32>
    %180 = arith.divf %178, %179 : vector<16x1xf32>
    %181 = vector.broadcast %171 : vector<16x1xf32> to vector<16x32xf32>
    %182 = arith.subf %163, %181 : vector<16x32xf32>
    %cst_79 = arith.constant 9.99999996E-13 : f32
    %183 = vector.broadcast %cst_79 : f32 to vector<16x1xf32>
    %184 = arith.addf %180, %183 : vector<16x1xf32>
    %185 = math.rsqrt %184 : vector<16x1xf32>
    %186 = vector.broadcast %185 : vector<16x1xf32> to vector<16x32xf32>
    %187 = arith.mulf %182, %186 : vector<16x32xf32>
    %188 = vector.broadcast %165 : vector<1x32xf32> to vector<16x32xf32>
    %189 = arith.mulf %187, %188 : vector<16x32xf32>
    %190 = vector.broadcast %167 : vector<1x32xf32> to vector<16x32xf32>
    %191 = arith.addf %189, %190 : vector<16x32xf32>
    %192 = arith.truncf %191 : vector<16x32xf32> to vector<16x32xbf16>
    %c1 = arith.constant 1 : index
    %c0_80 = arith.constant 0 : index
    %c0_81 = arith.constant 0 : index
    %193 = vector.load %arg4[%c1, %c0_80, %c0_81] : memref<2x32x96xbf16, #tpu.memory_space<vmem>>, vector<1x32x96xbf16>
    %194 = vector.shape_cast %193 : vector<1x32x96xbf16> to vector<32x96xbf16>
    %cst_82 = arith.constant dense<0.000000e+00> : vector<16x96xf32>
    %195 = tpu.matmul %192, %194, %cst_82 {dimension_numbers = #tpu.dot_dimension_numbers<[1], [0], [0], [1], [0, 0, 1, 1], [], []>} : vector<16x32xbf16>, vector<32x96xbf16>, vector<16x96xf32> -> vector<16x96xf32>
    %c1_83 = arith.constant 1 : index
    %c0_84 = arith.constant 0 : index
    %c0_85 = arith.constant 0 : index
    %196 = vector.load %arg5[%c1_83, %c0_84, %c0_85] : memref<2x1x96xf32, #tpu.memory_space<vmem>>, vector<1x1x96xf32>
    %197 = vector.shape_cast %196 : vector<1x1x96xf32> to vector<1x96xf32>
    %198 = vector.broadcast %197 : vector<1x96xf32> to vector<16x96xf32>
    %199 = arith.addf %195, %198 : vector<16x96xf32>
    %cst_86 = arith.constant 0.000000e+00 : f32
    %200 = vector.broadcast %cst_86 : f32 to vector<16x32xf32>
    %201 = vector.extract_strided_slice %199 {offsets = [0, 0], sizes = [16, 16], strides = [1, 1]} : vector<16x96xf32> to vector<16x16xf32>
    %cst_87 = arith.constant 2.500000e-01 : f32
    %202 = vector.broadcast %cst_87 : f32 to vector<16x16xf32>
    %203 = arith.mulf %201, %202 : vector<16x16xf32>
    %204 = vector.shape_cast %203 : vector<16x16xf32> to vector<2x8x16xf32>
    %205 = vector.extract_strided_slice %199 {offsets = [0, 32], sizes = [16, 16], strides = [1, 1]} : vector<16x96xf32> to vector<16x16xf32>
    %206 = vector.shape_cast %205 : vector<16x16xf32> to vector<2x8x16xf32>
    %207 = vector.extract_strided_slice %199 {offsets = [0, 64], sizes = [16, 16], strides = [1, 1]} : vector<16x96xf32> to vector<16x16xf32>
    %208 = vector.shape_cast %207 : vector<16x16xf32> to vector<2x8x16xf32>
    %209 = arith.truncf %204 : vector<2x8x16xf32> to vector<2x8x16xbf16>
    %210 = arith.truncf %206 : vector<2x8x16xf32> to vector<2x8x16xbf16>
    "tpu.trace_start"() <{level = 10 : i32, message = "bqd,bkd->bqk"}> : () -> ()
    %cst_88 = arith.constant dense<0.000000e+00> : vector<2x8x8xf32>
    %211 = tpu.matmul %209, %210, %cst_88 {dimension_numbers = #tpu.dot_dimension_numbers<[2], [2], [1], [1], [0, 0, 0, 1, 1, 1], [0], [0]>} : vector<2x8x16xbf16>, vector<2x8x16xbf16>, vector<2x8x8xf32> -> vector<2x8x8xf32>
    "tpu.trace_stop"() : () -> ()
    %212 = vector.broadcast %0 : vector<2x1x8xf32> to vector<2x8x8xf32>
    %213 = arith.addf %211, %212 : vector<2x8x8xf32>
    %cst_89 = arith.constant dense<0xFF800000> : vector<2x8xf32>
    %214 = vector.multi_reduction <maximumf>, %213, %cst_89 [2] : vector<2x8x8xf32> to vector<2x8xf32>
    %215 = vector.shape_cast %214 : vector<2x8xf32> to vector<2x8x1xf32>
    %216 = vector.broadcast %215 : vector<2x8x1xf32> to vector<2x8x8xf32>
    %217 = arith.subf %213, %216 : vector<2x8x8xf32>
    %218 = math.exp %217 : vector<2x8x8xf32>
    %cst_90 = arith.constant dense<0.000000e+00> : vector<2x8xf32>
    %219 = vector.multi_reduction <add>, %218, %cst_90 [2] : vector<2x8x8xf32> to vector<2x8xf32>
    %220 = vector.shape_cast %219 : vector<2x8xf32> to vector<2x8x1xf32>
    %221 = tpu.reciprocal %220 {approx = true} : vector<2x8x1xf32> -> vector<2x8x1xf32>
    %222 = vector.broadcast %221 : vector<2x8x1xf32> to vector<2x8x8xf32>
    %223 = arith.mulf %218, %222 : vector<2x8x8xf32>
    %224 = arith.truncf %223 : vector<2x8x8xf32> to vector<2x8x8xbf16>
    %225 = arith.truncf %208 : vector<2x8x16xf32> to vector<2x8x16xbf16>
    "tpu.trace_start"() <{level = 10 : i32, message = "bqk,bkd->bqd"}> : () -> ()
    %cst_91 = arith.constant dense<0.000000e+00> : vector<2x8x16xf32>
    %226 = tpu.matmul %224, %225, %cst_91 {dimension_numbers = #tpu.dot_dimension_numbers<[2], [1], [1], [2], [0, 0, 0, 1, 1, 2], [0], [0]>} : vector<2x8x8xbf16>, vector<2x8x16xbf16>, vector<2x8x16xf32> -> vector<2x8x16xf32>
    "tpu.trace_stop"() : () -> ()
    %227 = vector.shape_cast %226 : vector<2x8x16xf32> to vector<16x16xf32>
    %228 = arith.truncf %227 : vector<16x16xf32> to vector<16x16xbf16>
    %c1_92 = arith.constant 1 : index
    %c0_93 = arith.constant 0 : index
    %c0_94 = arith.constant 0 : index
    %229 = vector.load %arg6[%c1_92, %c0_93, %c0_94] : memref<2x32x32xbf16, #tpu.memory_space<vmem>>, vector<1x16x32xbf16>
    %230 = vector.shape_cast %229 : vector<1x16x32xbf16> to vector<16x32xbf16>
    %cst_95 = arith.constant dense<0.000000e+00> : vector<16x32xf32>
    %231 = tpu.matmul %228, %230, %cst_95 {dimension_numbers = #tpu.dot_dimension_numbers<[1], [0], [0], [1], [0, 0, 1, 1], [], []>} : vector<16x16xbf16>, vector<16x32xbf16>, vector<16x32xf32> -> vector<16x32xf32>
    %232 = arith.addf %200, %231 : vector<16x32xf32>
    %233 = vector.extract_strided_slice %199 {offsets = [0, 16], sizes = [16, 16], strides = [1, 1]} : vector<16x96xf32> to vector<16x16xf32>
    %cst_96 = arith.constant 2.500000e-01 : f32
    %234 = vector.broadcast %cst_96 : f32 to vector<16x16xf32>
    %235 = arith.mulf %233, %234 : vector<16x16xf32>
    %236 = vector.shape_cast %235 : vector<16x16xf32> to vector<2x8x16xf32>
    %237 = vector.extract_strided_slice %199 {offsets = [0, 48], sizes = [16, 16], strides = [1, 1]} : vector<16x96xf32> to vector<16x16xf32>
    %238 = vector.shape_cast %237 : vector<16x16xf32> to vector<2x8x16xf32>
    %239 = vector.extract_strided_slice %199 {offsets = [0, 80], sizes = [16, 16], strides = [1, 1]} : vector<16x96xf32> to vector<16x16xf32>
    %240 = vector.shape_cast %239 : vector<16x16xf32> to vector<2x8x16xf32>
    %241 = arith.truncf %236 : vector<2x8x16xf32> to vector<2x8x16xbf16>
    %242 = arith.truncf %238 : vector<2x8x16xf32> to vector<2x8x16xbf16>
    "tpu.trace_start"() <{level = 10 : i32, message = "bqd,bkd->bqk"}> : () -> ()
    %cst_97 = arith.constant dense<0.000000e+00> : vector<2x8x8xf32>
    %243 = tpu.matmul %241, %242, %cst_97 {dimension_numbers = #tpu.dot_dimension_numbers<[2], [2], [1], [1], [0, 0, 0, 1, 1, 1], [0], [0]>} : vector<2x8x16xbf16>, vector<2x8x16xbf16>, vector<2x8x8xf32> -> vector<2x8x8xf32>
    "tpu.trace_stop"() : () -> ()
    %244 = vector.broadcast %0 : vector<2x1x8xf32> to vector<2x8x8xf32>
    %245 = arith.addf %243, %244 : vector<2x8x8xf32>
    %cst_98 = arith.constant dense<0xFF800000> : vector<2x8xf32>
    %246 = vector.multi_reduction <maximumf>, %245, %cst_98 [2] : vector<2x8x8xf32> to vector<2x8xf32>
    %247 = vector.shape_cast %246 : vector<2x8xf32> to vector<2x8x1xf32>
    %248 = vector.broadcast %247 : vector<2x8x1xf32> to vector<2x8x8xf32>
    %249 = arith.subf %245, %248 : vector<2x8x8xf32>
    %250 = math.exp %249 : vector<2x8x8xf32>
    %cst_99 = arith.constant dense<0.000000e+00> : vector<2x8xf32>
    %251 = vector.multi_reduction <add>, %250, %cst_99 [2] : vector<2x8x8xf32> to vector<2x8xf32>
    %252 = vector.shape_cast %251 : vector<2x8xf32> to vector<2x8x1xf32>
    %253 = tpu.reciprocal %252 {approx = true} : vector<2x8x1xf32> -> vector<2x8x1xf32>
    %254 = vector.broadcast %253 : vector<2x8x1xf32> to vector<2x8x8xf32>
    %255 = arith.mulf %250, %254 : vector<2x8x8xf32>
    %256 = arith.truncf %255 : vector<2x8x8xf32> to vector<2x8x8xbf16>
    %257 = arith.truncf %240 : vector<2x8x16xf32> to vector<2x8x16xbf16>
    "tpu.trace_start"() <{level = 10 : i32, message = "bqk,bkd->bqd"}> : () -> ()
    %cst_100 = arith.constant dense<0.000000e+00> : vector<2x8x16xf32>
    %258 = tpu.matmul %256, %257, %cst_100 {dimension_numbers = #tpu.dot_dimension_numbers<[2], [1], [1], [2], [0, 0, 0, 1, 1, 2], [0], [0]>} : vector<2x8x8xbf16>, vector<2x8x16xbf16>, vector<2x8x16xf32> -> vector<2x8x16xf32>
    "tpu.trace_stop"() : () -> ()
    %259 = vector.shape_cast %258 : vector<2x8x16xf32> to vector<16x16xf32>
    %260 = arith.truncf %259 : vector<16x16xf32> to vector<16x16xbf16>
    %c1_101 = arith.constant 1 : index
    %c16_102 = arith.constant 16 : index
    %c0_103 = arith.constant 0 : index
    %261 = vector.load %arg6[%c1_101, %c16_102, %c0_103] : memref<2x32x32xbf16, #tpu.memory_space<vmem>>, vector<1x16x32xbf16>
    %262 = vector.shape_cast %261 : vector<1x16x32xbf16> to vector<16x32xbf16>
    %cst_104 = arith.constant dense<0.000000e+00> : vector<16x32xf32>
    %263 = tpu.matmul %260, %262, %cst_104 {dimension_numbers = #tpu.dot_dimension_numbers<[1], [0], [0], [1], [0, 0, 1, 1], [], []>} : vector<16x16xbf16>, vector<16x32xbf16>, vector<16x32xf32> -> vector<16x32xf32>
    %264 = arith.addf %232, %263 : vector<16x32xf32>
    %c1_105 = arith.constant 1 : index
    %c0_106 = arith.constant 0 : index
    %c0_107 = arith.constant 0 : index
    %265 = vector.load %arg7[%c1_105, %c0_106, %c0_107] : memref<2x1x32xf32, #tpu.memory_space<vmem>>, vector<1x1x32xf32>
    %266 = vector.shape_cast %265 : vector<1x1x32xf32> to vector<1x32xf32>
    %267 = vector.broadcast %266 : vector<1x32xf32> to vector<16x32xf32>
    %268 = arith.addf %264, %267 : vector<16x32xf32>
    %269 = arith.addf %191, %268 : vector<16x32xf32>
    %c1_108 = arith.constant 1 : index
    %c0_109 = arith.constant 0 : index
    %c0_110 = arith.constant 0 : index
    %270 = vector.load %arg8[%c1_108, %c0_109, %c0_110] : memref<2x1x32xf32, #tpu.memory_space<vmem>>, vector<1x1x32xf32>
    %271 = vector.shape_cast %270 : vector<1x1x32xf32> to vector<1x32xf32>
    %c1_111 = arith.constant 1 : index
    %c0_112 = arith.constant 0 : index
    %c0_113 = arith.constant 0 : index
    %272 = vector.load %arg9[%c1_111, %c0_112, %c0_113] : memref<2x1x32xf32, #tpu.memory_space<vmem>>, vector<1x1x32xf32>
    %273 = vector.shape_cast %272 : vector<1x1x32xf32> to vector<1x32xf32>
    %cst_114 = arith.constant dense<0.000000e+00> : vector<16xf32>
    %274 = vector.multi_reduction <add>, %269, %cst_114 [1] : vector<16x32xf32> to vector<16xf32>
    %275 = vector.shape_cast %274 : vector<16xf32> to vector<16x1xf32>
    %cst_115 = arith.constant 3.200000e+01 : f32
    %276 = vector.broadcast %cst_115 : f32 to vector<16x1xf32>
    %277 = arith.divf %275, %276 : vector<16x1xf32>
    %278 = vector.broadcast %277 : vector<16x1xf32> to vector<16x32xf32>
    %279 = arith.subf %269, %278 : vector<16x32xf32>
    %280 = vector.broadcast %277 : vector<16x1xf32> to vector<16x32xf32>
    %281 = arith.subf %269, %280 : vector<16x32xf32>
    %282 = arith.mulf %279, %281 : vector<16x32xf32>
    %cst_116 = arith.constant dense<0.000000e+00> : vector<16xf32>
    %283 = vector.multi_reduction <add>, %282, %cst_116 [1] : vector<16x32xf32> to vector<16xf32>
    %284 = vector.shape_cast %283 : vector<16xf32> to vector<16x1xf32>
    %cst_117 = arith.constant 3.200000e+01 : f32
    %285 = vector.broadcast %cst_117 : f32 to vector<16x1xf32>
    %286 = arith.divf %284, %285 : vector<16x1xf32>
    %287 = vector.broadcast %277 : vector<16x1xf32> to vector<16x32xf32>
    %288 = arith.subf %269, %287 : vector<16x32xf32>
    %cst_118 = arith.constant 9.99999996E-13 : f32
    %289 = vector.broadcast %cst_118 : f32 to vector<16x1xf32>
    %290 = arith.addf %286, %289 : vector<16x1xf32>
    %291 = math.rsqrt %290 : vector<16x1xf32>
    %292 = vector.broadcast %291 : vector<16x1xf32> to vector<16x32xf32>
    %293 = arith.mulf %288, %292 : vector<16x32xf32>
    %294 = vector.broadcast %271 : vector<1x32xf32> to vector<16x32xf32>
    %295 = arith.mulf %293, %294 : vector<16x32xf32>
    %296 = vector.broadcast %273 : vector<1x32xf32> to vector<16x32xf32>
    %297 = arith.addf %295, %296 : vector<16x32xf32>
    %298 = arith.truncf %297 : vector<16x32xf32> to vector<16x32xbf16>
    %c1_119 = arith.constant 1 : index
    %c0_120 = arith.constant 0 : index
    %c0_121 = arith.constant 0 : index
    %299 = vector.load %arg10[%c1_119, %c0_120, %c0_121] : memref<2x32x64xbf16, #tpu.memory_space<vmem>>, vector<1x32x64xbf16>
    %300 = vector.shape_cast %299 : vector<1x32x64xbf16> to vector<32x64xbf16>
    %cst_122 = arith.constant dense<0.000000e+00> : vector<16x64xf32>
    %301 = tpu.matmul %298, %300, %cst_122 {dimension_numbers = #tpu.dot_dimension_numbers<[1], [0], [0], [1], [0, 0, 1, 1], [], []>} : vector<16x32xbf16>, vector<32x64xbf16>, vector<16x64xf32> -> vector<16x64xf32>
    %c1_123 = arith.constant 1 : index
    %c0_124 = arith.constant 0 : index
    %c0_125 = arith.constant 0 : index
    %302 = vector.load %arg11[%c1_123, %c0_124, %c0_125] : memref<2x1x64xf32, #tpu.memory_space<vmem>>, vector<1x1x64xf32>
    %303 = vector.shape_cast %302 : vector<1x1x64xf32> to vector<1x64xf32>
    %304 = vector.broadcast %303 : vector<1x64xf32> to vector<16x64xf32>
    %305 = arith.addf %301, %304 : vector<16x64xf32>
    %cst_126 = arith.constant 5.000000e-01 : f32
    %306 = vector.broadcast %cst_126 : f32 to vector<16x64xf32>
    %307 = arith.mulf %306, %305 : vector<16x64xf32>
    %cst_127 = arith.constant 4.471500e-02 : f32
    %308 = vector.broadcast %cst_127 : f32 to vector<16x64xf32>
    %309 = arith.mulf %308, %305 : vector<16x64xf32>
    %310 = arith.mulf %309, %305 : vector<16x64xf32>
    %311 = arith.mulf %310, %305 : vector<16x64xf32>
    %312 = arith.addf %305, %311 : vector<16x64xf32>
    %cst_128 = arith.constant 0.797884583 : f32
    %313 = vector.broadcast %cst_128 : f32 to vector<16x64xf32>
    %314 = arith.mulf %313, %312 : vector<16x64xf32>
    %315 = math.tanh %314 : vector<16x64xf32>
    %cst_129 = arith.constant 1.000000e+00 : f32
    %316 = vector.broadcast %cst_129 : f32 to vector<16x64xf32>
    %317 = arith.addf %316, %315 : vector<16x64xf32>
    %318 = arith.mulf %307, %317 : vector<16x64xf32>
    %319 = arith.truncf %318 : vector<16x64xf32> to vector<16x64xbf16>
    %c1_130 = arith.constant 1 : index
    %c0_131 = arith.constant 0 : index
    %c0_132 = arith.constant 0 : index
    %320 = vector.load %arg12[%c1_130, %c0_131, %c0_132] : memref<2x64x32xbf16, #tpu.memory_space<vmem>>, vector<1x64x32xbf16>
    %321 = vector.shape_cast %320 : vector<1x64x32xbf16> to vector<64x32xbf16>
    %cst_133 = arith.constant dense<0.000000e+00> : vector<16x32xf32>
    %322 = tpu.matmul %319, %321, %cst_133 {dimension_numbers = #tpu.dot_dimension_numbers<[1], [0], [0], [1], [0, 0, 1, 1], [], []>} : vector<16x64xbf16>, vector<64x32xbf16>, vector<16x32xf32> -> vector<16x32xf32>
    %c1_134 = arith.constant 1 : index
    %c0_135 = arith.constant 0 : index
    %c0_136 = arith.constant 0 : index
    %323 = vector.load %arg13[%c1_134, %c0_135, %c0_136] : memref<2x1x32xf32, #tpu.memory_space<vmem>>, vector<1x1x32xf32>
    %324 = vector.shape_cast %323 : vector<1x1x32xf32> to vector<1x32xf32>
    %325 = vector.broadcast %324 : vector<1x32xf32> to vector<16x32xf32>
    %326 = arith.addf %322, %325 : vector<16x32xf32>
    %327 = arith.addf %297, %326 : vector<16x32xf32>
    %c1_137 = arith.constant 1 : index
    %c0_138 = arith.constant 0 : index
    %c0_139 = arith.constant 0 : index
    %328 = vector.load %arg14[%c1_137, %c0_138, %c0_139] : memref<2x1x32xf32, #tpu.memory_space<vmem>>, vector<1x1x32xf32>
    %329 = vector.shape_cast %328 : vector<1x1x32xf32> to vector<1x32xf32>
    %c1_140 = arith.constant 1 : index
    %c0_141 = arith.constant 0 : index
    %c0_142 = arith.constant 0 : index
    %330 = vector.load %arg15[%c1_140, %c0_141, %c0_142] : memref<2x1x32xf32, #tpu.memory_space<vmem>>, vector<1x1x32xf32>
    %331 = vector.shape_cast %330 : vector<1x1x32xf32> to vector<1x32xf32>
    %cst_143 = arith.constant dense<0.000000e+00> : vector<16xf32>
    %332 = vector.multi_reduction <add>, %327, %cst_143 [1] : vector<16x32xf32> to vector<16xf32>
    %333 = vector.shape_cast %332 : vector<16xf32> to vector<16x1xf32>
    %cst_144 = arith.constant 3.200000e+01 : f32
    %334 = vector.broadcast %cst_144 : f32 to vector<16x1xf32>
    %335 = arith.divf %333, %334 : vector<16x1xf32>
    %336 = vector.broadcast %335 : vector<16x1xf32> to vector<16x32xf32>
    %337 = arith.subf %327, %336 : vector<16x32xf32>
    %338 = vector.broadcast %335 : vector<16x1xf32> to vector<16x32xf32>
    %339 = arith.subf %327, %338 : vector<16x32xf32>
    %340 = arith.mulf %337, %339 : vector<16x32xf32>
    %cst_145 = arith.constant dense<0.000000e+00> : vector<16xf32>
    %341 = vector.multi_reduction <add>, %340, %cst_145 [1] : vector<16x32xf32> to vector<16xf32>
    %342 = vector.shape_cast %341 : vector<16xf32> to vector<16x1xf32>
    %cst_146 = arith.constant 3.200000e+01 : f32
    %343 = vector.broadcast %cst_146 : f32 to vector<16x1xf32>
    %344 = arith.divf %342, %343 : vector<16x1xf32>
    %345 = vector.broadcast %335 : vector<16x1xf32> to vector<16x32xf32>
    %346 = arith.subf %327, %345 : vector<16x32xf32>
    %cst_147 = arith.constant 9.99999996E-13 : f32
    %347 = vector.broadcast %cst_147 : f32 to vector<16x1xf32>
    %348 = arith.addf %344, %347 : vector<16x1xf32>
    %349 = math.rsqrt %348 : vector<16x1xf32>
    %350 = vector.broadcast %349 : vector<16x1xf32> to vector<16x32xf32>
    %351 = arith.mulf %346, %350 : vector<16x32xf32>
    %352 = vector.broadcast %329 : vector<1x32xf32> to vector<16x32xf32>
    %353 = arith.mulf %351, %352 : vector<16x32xf32>
    %354 = vector.broadcast %331 : vector<1x32xf32> to vector<16x32xf32>
    %355 = arith.addf %353, %354 : vector<16x32xf32>
    %356 = vector.shape_cast %355 : vector<16x32xf32> to vector<2x8x32xf32>
    %357 = vector.extract_strided_slice %356 {offsets = [0, 0, 0], sizes = [2, 1, 32], strides = [1, 1, 1]} : vector<2x8x32xf32> to vector<2x1x32xf32>
    %358 = vector.shape_cast %357 : vector<2x1x32xf32> to vector<2x32xf32>
    %c0_148 = arith.constant 0 : index
    %c0_149 = arith.constant 0 : index
    %359 = vector.load %arg16[%c0_148, %c0_149] : memref<2x32xf32, #tpu.memory_space<vmem>>, vector<2x32xf32>
    tpu.vector_store %arg16[%c0_148, %c0_149], %358 {strides = array<i32>} : memref<2x32xf32, #tpu.memory_space<vmem>>, vector<2x32xf32>,
    return
  }
}

</mosaic_0001>

<bundles_post_ra>
// kernel: bioclinicalbert_ft_forward.1
= control target key start
LH: loop header
LB: loop body
LE: loop exit
PB: predicated region body
PF: predicated region fallthrough
CT: control target
= control target key end

     0   :  { %s2848_s0 = inlined_call_operand.vmem [shape: f32[16,32], index: 0, kind: input, shape index: {}]   ;;  %s2849_s1 = inlined_call_operand.vmem [shape: f32[2,1,8], index: 1, kind: input, shape index: {}]   ;;  %s2850_s2 = inlined_call_operand.vmem [shape: f32[1,32], index: 2, kind: input, shape index: {}]   ;;  %s2851_s3 = inlined_call_operand.vmem [shape: f32[1,32], index: 3, kind: input, shape index: {}]   ;;  %s2852_s4 = inlined_call_operand.vmem [shape: bf16[2,32,96], index: 4, kind: input, shape index: {}]   ;;  %s2853_s5 = inlined_call_operand.vmem [shape: f32[2,1,96], index: 5, kind: input, shape index: {}]   ;;  %s2854_s6 = inlined_call_operand.vmem [shape: bf16[2,32,32], index: 6, kind: input, shape index: {}]   ;;  %s2855_s7 = inlined_call_operand.vmem [shape: f32[2,1,32], index: 7, kind: input, shape index: {}]   ;;  %s2856_s8 = inlined_call_operand.vmem [shape: f32[2,1,32], index: 8, kind: input, shape index: {}]   ;;  %s2857_s9 = inlined_call_operand.vmem [shape: f32[2,1,32], index: 9, kind: input, shape index: {}]   ;;  %s2858_s10 = inlined_call_operand.vmem [shape: bf16[2,32,64], index: 10, kind: input, shape index: {}]   ;;  %s2859_s11 = inlined_call_operand.vmem [shape: f32[2,1,64], index: 11, kind: input, shape index: {}]   ;;  %s2860_s12 = inlined_call_operand.vmem [shape: bf16[2,64,32], index: 12, kind: input, shape index: {}]   ;;  %s2861_s13 = inlined_call_operand.vmem [shape: f32[2,1,32], index: 13, kind: input, shape index: {}]   ;;  %s2862_s14 = inlined_call_operand.vmem [shape: f32[2,1,32], index: 14, kind: input, shape index: {}]   ;;  %s2863_s15 = inlined_call_operand.vmem [shape: f32[2,1,32], index: 15, kind: input, shape index: {}]   ;;  %s2864_s16 = inlined_call_operand.hbm [shape: f32[2,32], index: 16, kind: output, shape index: {}]  }
   0x1   :  { %2866 = sst [smem:[#allocation5_spill]] %s2848_s0 }
   0x2   :  { %s2867_s23 = sld [smem:[#allocation5_spill]]  ;;  %vm61_vm0 = vcmask 261120  }
   0x8   :  { %v57_v0 = vld [vmem:[%s2867_s23] sm:$0xff]  ;;  %v58_v1 = vld [vmem:[%s2867_s23 + $0x8] sm:$0xff] }
   0x9   :  { %v62_v2 = vsel %vm61_vm0, %v57_v0, 0.0  ;;  %v65_v3 = vsel %vm61_vm0, %v58_v1, 0.0 }
   0xa   :  { %63 = vadd.xlane.f32.xlu0 %v62_v2 }
   0xe   :  { %66 = vadd.xlane.f32.xlu0 %v65_v3 }
   0xf   :  { %21 = vsyncpa [#allocation3], 0  ;;  %v2277_v14 = vld [vmem:[%s2852_s4 + $0x8] sm:$0xff]   ;;  %v2379_v15 = vmov 0.0   ;;  %vm2380_vm1 = vmmov 0   ;;  %v2278_v16 = vld [vmem:[%s2852_s4] sm:$0xff]  }
  0x10   :  { %2093 = vmatprep.subr.bf16.mxu1 %v2379_v15  ;;  %2097 = vmatprep.mubr.msk.bf16.mxu1 %vm2380_vm1, %v2379_v15  ;;  %v1937_v25 = vld [vmem:[%s2850_s2] ss:$0 sm:$0xff]  ;;  %vm194_vm2 = vcmask 130048   ;;  %vm290_vm3 = vcmask 64512   ;;  %v2541_v55 = vld [vmem:[%s2849_s1 + $0x1] ss:$0 sm:$0xff] }
  0x11   :  { %2094 = vmatpush3.bf16.msra.mxu1 %v2277_v14  ;;  %2107 = vmatprep.subr.bf16.mxu0 %v2379_v15  ;;  %v1938_v29 = vld [vmem:[%s2851_s3] ss:$0 sm:$0xff]  ;;  %s2381_s3 = smov 96   ;;  %s2382_s24 = smov 64   ;;  %vm320_vm4 = vcmask 1043456   ;;  %vm921_vm5 = vcmask 523264  }
  0x12   :  { %2095 = vmatprep.subr.bf16.mxu1 %v2379_v15  ;;  %2109 = vmatprep.mubr.msk.bf16.mxu0 %vm2380_vm1, %v2379_v15  ;;  %v1939_v34 = vld [vmem:[%s2853_s5] ss:$0 sm:$0xff]  ;;  %s2384_s25 = smov 112   ;;  %s2385_s26 = smov 48   ;;  %vm1918_vm6 = vcmask 1041409   ;;  %vm1921_vm7 = vcmask 254976  }
  0x13   :  { %v2535_v51 = vld [vmem:[%s2849_s1] ss:$0 sm:$0xff]  ;;  %s2383_s1 = smov 80  }
  0x15   :  { %2096 = vmatpush3.bf16.msra.mxu1 %v2278_v16 }
  0x16   :  { %2101 = vmatprep.subr.bf16.mxu1 %v2379_v15 }
  0x93   :  { %v64_v4 = vpop.xlane.xlu0 %63 }
  0x94   :  { %v69_v5 = vmul.f32 0.03125, %v64_v4 }
  0x96   :  { %v71_v6 = vsub.f32 %v57_v0, %v69_v5 }
  0x97   :  { %v67_v7 = vpop.xlane.xlu0 %66 }
  0x98   :  { %v70_v8 = vmul.f32 0.03125, %v67_v7  ;;  %v73_v9 = vmul.f32 %v71_v6, %v71_v6 }
  0x9a   :  { %v72_v10 = vsub.f32 %v58_v1, %v70_v8  ;;  %v75_v11 = vsel %vm61_vm0, %v73_v9, 0.0 }
  0x9b   :  { %76 = vadd.xlane.f32.xlu1 %v75_v11 }
  0x9c   :  { %v74_v12 = vmul.f32 %v72_v10, %v72_v10 }
  0x9e   :  { %v78_v13 = vsel %vm61_vm0, %v74_v12, 0.0 }
  0x9f   :  { %79 = vadd.xlane.f32.xlu1 %v78_v13 }
 0x124   :  { %v77_v17 = vpop.xlane.xlu1 %76 }
 0x125   :  { %v81_v18 = vmul.f32 0.03125, %v77_v17 }
 0x127   :  { %v83_v19 = vadd.f32 1e-12, %v81_v18 }
 0x128   :  { %v80_v20 = vpop.xlane.xlu1 %79 }
 0x129   :  { %2297 = vrsqrt.f32 %v83_v19  ;;  %v82_v21 = vmul.f32 0.03125, %v80_v20 }
 0x12b   :  { %v84_v22 = vadd.f32 1e-12, %v82_v21 }
 0x12d   :  { %2299 = vrsqrt.f32 %v84_v22 }
 0x136   :  { %v2298_v23 = vpop.eup %2297 }
 0x137   :  { %v87_v24 = vmul.f32 %v2298_v23, %v71_v6 }
 0x139   :  { %v95_v28 = vmul.f32 %v1937_v25, %v87_v24 }
 0x13a   :  { %v2300_v26 = vpop.eup %2299 }
 0x13b   :  { %v88_v27 = vmul.f32 %v2300_v26, %v72_v10  ;;  %v2502_v31 = vadd.f32 %v1938_v29, %v95_v28 }
 0x13d   :  { %v96_v30 = vmul.f32 %v1937_v25, %v88_v27 }
 0x13f   :  { %v2504_v32 = vadd.f32 %v1938_v29, %v96_v30 }
 0x141   :  { %v105_v33 = vpack.c.bf16 %v2504_v32, %v2502_v31 }
 0x143   :  { %2098 = vmatmul.mubr.msk.bf16.vlgmr.msra.gmra.mxu1 %vm61_vm0, %v105_v33 }
 0x144   :  { %2103 = vmatprep.mubr.msk.bf16.mxu1 %vm2380_vm1, %v2379_v15 }
 0x203   :  { %v166_v35 = vpop.f32.mrf.mxu1 }
 0x204   :  { %v167_v36 = vadd.f32 %v1939_v34, %v166_v35 }
 0x205   :  { %v2099_v37 = vpop.f32.mrf.mxu1 }
 0x206   :  { %v2514_v38 = vpack.c.bf16 %v167_v36, %v167_v36  ;;  %v173_v45 = vmul.f32 0.25, %v167_v36 }
 0x207   :  { %v169_v39 = vpop.f32.mrf.mxu1 }
 0x208   :  { %v170_v40 = vadd.f32 %v1939_v34, %v169_v39  ;;  %192 = vrot.lane.b32.xlu0 %v2514_v38, %s2381_s3  ;;  %v175_v48 = vpack.c.bf16 %v173_v45, %v173_v45 }
 0x209   :  { %v2100_v41 = vpop.f32.mrf.mxu1 }
 0x20a   :  { %v2518_v42 = vpack.c.bf16 %v170_v40, %v170_v40  ;;  %v174_v49 = vmul.f32 0.25, %v170_v40 }
 0x20c   :  { %242 = vrot.lane.b32.xlu1 %v2518_v42, %s2381_s3  ;;  %v176_v50 = vpack.c.bf16 %v174_v49, %v174_v49 }
 0x27a   :  { %v193_v43 = vpop.permute.xlu0 %192 }
 0x27b   :  { %v199_v44 = vsel %vm194_vm2, %v193_v43, 0 }
 0x27c   :  { %2102 = vmatpush3.bf16.xpose.msra.mxu1 %v199_v44 }
 0x27d   :  { %2113 = vmatprep.subr.bf16.mxu1 %v2379_v15 }
 0x27e   :  { %v243_v46 = vpop.permute.xlu1 %242 }
 0x27f   :  { %v248_v47 = vsel %vm194_vm2, %v243_v46, 0 }
 0x280   :  { %2108 = vmatpush3.bf16.xpose.msra.mxu0 %v248_v47 }
 0x281   :  { %2119 = vmatprep.subr.bf16.mxu0 %v2379_v15 }
 0x283   :  { %2104 = vmatmul.mubr.msk.bf16.vlgmr.msra.gmra.mxu1 %vm194_vm2, %v175_v48 }
 0x284   :  { %2115 = vmatprep.mubr.msk.bf16.mxu1 %vm2380_vm1, %v2379_v15 }
 0x287   :  { %2110 = vmatmul.mubr.msk.bf16.vlgmr.msra.gmra.mxu0 %vm194_vm2, %v176_v50 }
 0x288   :  { %2121 = vmatprep.mubr.msk.bf16.mxu0 %vm2380_vm1, %v2379_v15 }
 0x343   :  { %v235_v52 = vpop.f32.mrf.mxu1 }
 0x344   :  { %v236_v53 = vadd.f32 %v2535_v51, %v235_v52 }
 0x345   :  { %v2105_v54 = vpop.f32.mrf.mxu1 }
 0x346   :  { %v291_v56 = vsel %vm290_vm3, %v236_v53, -inf }
 0x347   :  { %v238_v57 = vpop.f32.mrf.mxu1  ;;  %v284_v58 = vpop.f32.mrf.mxu0  ;;  %292 = vmax.xlane.f32.xlu1 %v291_v56 }
 0x348   :  { %v285_v59 = vadd.f32 %v2541_v55, %v284_v58 }
 0x349   :  { %v2106_v60 = vpop.f32.mrf.mxu1  ;;  %v2111_v61 = vpop.f32.mrf.mxu0 }
 0x34a   :  { %v294_v62 = vsel %vm290_vm3, %v285_v59, -inf }
 0x34b   :  { %v287_v63 = vpop.f32.mrf.mxu0  ;;  %295 = vmax.xlane.f32.xlu0 %v294_v62 }
 0x34d   :  { %v2112_v0 = vpop.f32.mrf.mxu0 }
 0x358   :  { %364 = vrot.lane.b32.xlu1 %v2518_v42, %s2382_s24 }
 0x35c   :  { %418 = vrot.lane.b32.xlu1 %v2514_v38, %s2383_s1 }
 0x3d0   :  { %v293_v1 = vpop.xlane.xlu1 %292 }
 0x3d1   :  { %v297_v2 = vsub.f32 %v236_v53, %v293_v1 }
 0x3d3   :  { %v299_v3 = vmul.f32 1.442695, %v297_v2 }
 0x3d4   :  { %v296_v4 = vpop.xlane.xlu0 %295  ;;  %v365_v5 = vpop.permute.xlu1 %364 }
 0x3d5   :  { %2301 = vpow2.f32 %v299_v3  ;;  %v298_v6 = vsub.f32 %v285_v59, %v296_v4  ;;  %v370_v7 = vsel %vm320_vm4, %v365_v5, 0 }
 0x3d6   :  { %2120 = vmatpush3.bf16.msra.mxu0 %v370_v7 }
 0x3d7   :  { %v301_v8 = vmul.f32 1.442695, %v298_v6  ;;  %2131 = vmatprep.subr.bf16.mxu0 %v2379_v15 }
 0x3d8   :  { %v419_v13 = vpop.permute.xlu1 %418 }
 0x3d9   :  { %2303 = vpow2.f32 %v301_v8  ;;  %v424_v23 = vsel %vm194_vm2, %v419_v13, 0 }
 0x3e2   :  { %v2302_v9 = vpop.eup %2301 }
 0x3e3   :  { %v303_v10 = vsel %vm290_vm3, %v2302_v9, 0.0 }
 0x3e4   :  { %304 = vadd.xlane.f32.xlu0 %v303_v10 }
 0x3e6   :  { %v2304_v11 = vpop.eup %2303 }
 0x3e7   :  { %v306_v12 = vsel %vm290_vm3, %v2304_v11, 0.0 }
 0x3e8   :  { %307 = vadd.xlane.f32.xlu1 %v306_v12 }
 0x3f9   :  { %469 = vrot.lane.b32.xlu1 %v2518_v42, %s2383_s1 }
 0x3fa   :  { %315 = vrot.lane.b32.xlu0 %v2514_v38, %s2382_s24 }
 0x3fd   :  { %467 = vrot.lane.b32.xlu1 %v176_v50, %s2384_s25 }
 0x3fe   :  { %416 = vrot.lane.b32.xlu0 %v175_v48, %s2384_s25 }
 0x46d   :  { %v305_v14 = vpop.xlane.xlu0 %304 }
 0x46e   :  { %2305 = vrcp.f32 %v305_v14  ;;  %v2280_v14 = vld [vmem:[%s2854_s6 + $0x8] sm:$0xff]  }
 0x471   :  { %v316_v16 = vpop.permute.xlu0 %315  ;;  %v308_v17 = vpop.xlane.xlu1 %307 }
 0x472   :  { %v322_v18 = vsel %vm320_vm4, %v316_v16, 0  ;;  %2307 = vrcp.f32 %v308_v17 }
 0x473   :  { %2114 = vmatpush3.bf16.msra.mxu1 %v322_v18 }
 0x474   :  { %2125 = vmatprep.subr.bf16.mxu1 %v2379_v15 }
 0x475   :  { %v470_v25 = vpop.permute.xlu1 %469  ;;  %v417_v28 = vpop.permute.xlu0 %416 }
 0x476   :  { %v475_v27 = vsel %vm194_vm2, %v470_v25, 0 }
 0x479   :  { %v468_v29 = vpop.permute.xlu1 %467 }
 0x47b   :  { %v2306_v19 = vpop.eup %2305 }
 0x47c   :  { %v311_v20 = vmul.f32 %v2306_v19, %v2302_v9 }
 0x47e   :  { %v313_v21 = vpack.c.bf16 %v311_v20, %v311_v20 }
 0x47f   :  { %v2308_v22 = vpop.eup %2307 }
 0x480   :  { %2116 = vmatmul.mubr.msk.bf16.vlgmr.msra.gmra.mxu1 %vm290_vm3, %v313_v21  ;;  %v312_v24 = vmul.f32 %v2308_v22, %v2304_v11 }
 0x481   :  { %2126 = vmatpush3.bf16.xpose.msra.mxu1 %v424_v23  ;;  %2127 = vmatprep.mubr.msk.bf16.mxu1 %vm2380_vm1, %v2379_v15 }
 0x482   :  { %v314_v26 = vpack.c.bf16 %v312_v24, %v312_v24  ;;  %2137 = vmatprep.subr.bf16.mxu1 %v2379_v15 }
 0x484   :  { %2122 = vmatmul.mubr.msk.bf16.vlgmr.msra.gmra.mxu0 %vm290_vm3, %v314_v26 }
 0x485   :  { %2132 = vmatpush3.bf16.xpose.msra.mxu0 %v475_v27  ;;  %2133 = vmatprep.mubr.msk.bf16.mxu0 %vm2380_vm1, %v2379_v15 }
 0x486   :  { %2143 = vmatprep.subr.bf16.mxu0 %v2379_v15 }
 0x488   :  { %2128 = vmatmul.mubr.msk.bf16.vlgmr.msra.gmra.mxu1 %vm194_vm2, %v417_v28 }
 0x489   :  { %2139 = vmatprep.mubr.msk.bf16.mxu1 %vm2380_vm1, %v2379_v15 }
 0x48c   :  { %2134 = vmatmul.mubr.msk.bf16.vlgmr.msra.gmra.mxu0 %vm194_vm2, %v468_v29 }
 0x48d   :  { %2145 = vmatprep.mubr.msk.bf16.mxu0 %vm2380_vm1, %v2379_v15 }
 0x540   :  { %v2578_v30 = vpop.f32.mrf.mxu1 }
 0x542   :  { %v2117_v33 = vpop.f32.mrf.mxu1 }
 0x544   :  { %v361_v34 = vpop.f32.mrf.mxu1  ;;  %v2580_v35 = vpop.f32.mrf.mxu0 }
 0x545   :  { %v412_v36 = vpack.c.bf16 %v2580_v35, %v2578_v30  ;;  %v1957_v30 = vld [vmem:[%s2855_s7] ss:$0 sm:$0xff] }
 0x546   :  { %v2118_v37 = vpop.f32.mrf.mxu1  ;;  %v2123_v39 = vpop.f32.mrf.mxu0 }
 0x548   :  { %v409_v40 = vpop.f32.mrf.mxu0  ;;  %v460_v41 = vpop.f32.mrf.mxu1 }
 0x549   :  { %v461_v43 = vadd.f32 %v2535_v51, %v460_v41 }
 0x54a   :  { %v2124_v44 = vpop.f32.mrf.mxu0  ;;  %v2129_v45 = vpop.f32.mrf.mxu1 }
 0x54b   :  { %v517_v46 = vsel %vm290_vm3, %v461_v43, -inf }
 0x54c   :  { %518 = vmax.xlane.f32.xlu0 %v517_v46  ;;  %v463_v47 = vpop.f32.mrf.mxu1  ;;  %v511_v48 = vpop.f32.mrf.mxu0 }
 0x54d   :  { %v512_v49 = vadd.f32 %v2541_v55, %v511_v48 }
 0x54e   :  { %v2130_v50 = vpop.f32.mrf.mxu1  ;;  %v2135_v52 = vpop.f32.mrf.mxu0 }
 0x54f   :  { %v520_v53 = vsel %vm290_vm3, %v512_v49, -inf }
 0x550   :  { %521 = vmax.xlane.f32.xlu1 %v520_v53  ;;  %v514_v54 = vpop.f32.mrf.mxu0 }
 0x552   :  { %v2136_v56 = vpop.f32.mrf.mxu0 }
 0x561   :  { %589 = vrot.lane.b32.xlu1 %v2518_v42, %s2385_s26 }
 0x5d5   :  { %v519_v57 = vpop.xlane.xlu0 %518 }
 0x5d6   :  { %v523_v58 = vsub.f32 %v461_v43, %v519_v57  ;;  %v2282_v57 = vld [vmem:[%s2858_s10] sm:$0xff]  }
 0x5d8   :  { %v525_v59 = vmul.f32 1.442695, %v523_v58 }
 0x5d9   :  { %v522_v60 = vpop.xlane.xlu1 %521 }
 0x5da   :  { %2309 = vpow2.f32 %v525_v59  ;;  %v524_v61 = vsub.f32 %v512_v49, %v522_v60 }
 0x5dc   :  { %v527_v62 = vmul.f32 1.442695, %v524_v61 }
 0x5dd   :  { %v590_v63 = vpop.permute.xlu1 %589 }
 0x5de   :  { %2311 = vpow2.f32 %v527_v62  ;;  %v595_v0 = vsel %vm320_vm4, %v590_v63, 0 }
 0x5df   :  { %2144 = vmatpush3.bf16.msra.mxu0 %v595_v0 }
 0x5e0   :  { %2155 = vmatprep.subr.bf16.mxu0 %v2379_v15 }
 0x5e7   :  { %v2310_v1 = vpop.eup %2309 }
 0x5e8   :  { %v529_v2 = vsel %vm290_vm3, %v2310_v1, 0.0 }
 0x5e9   :  { %530 = vadd.xlane.f32.xlu0 %v529_v2  ;;  %v1958_v2 = vld [vmem:[%s2856_s8] ss:$0 sm:$0xff] }
 0x5eb   :  { %v2312_v3 = vpop.eup %2311 }
 0x5ec   :  { %v532_v42 = vsel %vm290_vm3, %v2312_v3, 0.0 }
 0x5ed   :  { %533 = vadd.xlane.f32.xlu0 %v532_v42 }
 0x603   :  { %541 = vrot.lane.b32.xlu0 %v2514_v38, %s2385_s26  ;;  %v2279_v38 = vld [vmem:[%s2854_s6] sm:$0xff]  }
 0x672   :  { %v531_v4 = vpop.xlane.xlu0 %530 }
 0x673   :  { %2313 = vrcp.f32 %v531_v4 }
 0x676   :  { %v534_v5 = vpop.xlane.xlu0 %533 }
 0x677   :  { %2315 = vrcp.f32 %v534_v5  ;;  %v1959_v5 = vld [vmem:[%s2857_s9] ss:$0 sm:$0xff] }
 0x67a   :  { %v542_v6 = vpop.permute.xlu0 %541 }
 0x67b   :  { %v547_v7 = vsel %vm320_vm4, %v542_v6, 0 }
 0x67c   :  { %2138 = vmatpush3.bf16.msra.mxu1 %v547_v7 }
 0x67d   :  { %2149 = vmatprep.subr.bf16.mxu1 %v2379_v15 }
 0x680   :  { %v2314_v8 = vpop.eup %2313 }
 0x681   :  { %v537_v9 = vmul.f32 %v2314_v8, %v2310_v1 }
 0x683   :  { %v539_v10 = vpack.c.bf16 %v537_v9, %v537_v9 }
 0x684   :  { %v2316_v11 = vpop.eup %2315 }
 0x685   :  { %2140 = vmatmul.mubr.msk.bf16.vlgmr.msra.gmra.mxu1 %vm290_vm3, %v539_v10  ;;  %v538_v12 = vmul.f32 %v2316_v11, %v2312_v3  ;;  %v2283_v10 = vld [vmem:[%s2860_s12 + $0x18] sm:$0xff]   ;;  %v2284_v11 = vld [vmem:[%s2860_s12 + $0x10] sm:$0xff]  }
 0x686   :  { %2151 = vmatprep.mubr.msk.bf16.mxu1 %vm2380_vm1, %v2379_v15  ;;  %2150 = vmatpush3.bf16.msra.mxu1 %v2280_v14 }
 0x687   :  { %v540_v13 = vpack.c.bf16 %v538_v12, %v538_v12  ;;  %2161 = vmatprep.subr.bf16.mxu1 %v2379_v15  ;;  %v2285_v12 = vld [vmem:[%s2860_s12 + $0x8] sm:$0xff]  }
 0x689   :  { %2146 = vmatmul.mubr.msk.bf16.vlgmr.msra.gmra.mxu0 %vm290_vm3, %v540_v13  ;;  %v1960_v13 = vld [vmem:[%s2859_s11] ss:$0 sm:$0xff] }
 0x68a   :  { %2156 = vmatpush3.bf16.msra.mxu0 %v2279_v38  ;;  %2157 = vmatprep.mubr.msk.bf16.mxu0 %vm2380_vm1, %v2379_v15  ;;  %v2286_v38 = vld [vmem:[%s2860_s12] sm:$0xff]  }
 0x68b   :  { %2169 = vmatprep.subr.bf16.mxu0 %v2379_v15 }
 0x691   :  { %2158 = vmatmul.mubr.msk.bf16.vlgmr.msra.gmra.mxu0 %vm194_vm2, %v412_v36 }
 0x692   :  { %2177 = vmatprep.mubr.msk.bf16.mxu0 %vm2380_vm1, %v2379_v15  ;;  %2170 = vmatpush3.bf16.msra.mxu0 %v2283_v10  ;;  %v1970_v10 = vld [vmem:[%s2862_s14] ss:$0 sm:$0xff] }
 0x693   :  { %2171 = vmatprep.subr.bf16.mxu0 %v2379_v15 }
 0x696   :  { %2172 = vmatpush3.bf16.msra.mxu0 %v2284_v11 }
 0x697   :  { %2173 = vmatprep.subr.bf16.mxu0 %v2379_v15 }
 0x69a   :  { %2174 = vmatpush3.bf16.msra.mxu0 %v2285_v12 }
 0x69b   :  { %2175 = vmatprep.subr.bf16.mxu0 %v2379_v15 }
 0x69e   :  { %2176 = vmatpush3.bf16.msra.mxu0 %v2286_v38 }
 0x69f   :  { %2195 = vmatprep.subr.bf16.mxu0 %v2379_v15 }
 0x745   :  { %v583_v16 = vpop.f32.mrf.mxu1 }
 0x747   :  { %v2141_v17 = vpop.f32.mrf.mxu1 }
 0x749   :  { %v586_v18 = vpop.f32.mrf.mxu1  ;;  %v631_v19 = vpop.f32.mrf.mxu0 }
 0x74a   :  { %v637_v20 = vpack.c.bf16 %v631_v19, %v583_v16 }
 0x74b   :  { %v2142_v21 = vpop.f32.mrf.mxu1  ;;  %v2147_v22 = vpop.f32.mrf.mxu0 }
 0x74c   :  { %2152 = vmatmul.mubr.msk.bf16.vlgmr.msra.gmra.mxu1 %vm194_vm2, %v637_v20 }
 0x74d   :  { %v634_v23 = vpop.f32.mrf.mxu0  ;;  %2165 = vmatprep.mubr.msk.bf16.mxu1 %vm2380_vm1, %v2379_v15 }
 0x74f   :  { %v2148_v24 = vpop.f32.mrf.mxu0 }
 0x751   :  { %v733_v25 = vpop.f32.mrf.mxu0 }
 0x753   :  { %v2159_v26 = vpop.f32.mrf.mxu0 }
 0x755   :  { %v736_v27 = vpop.f32.mrf.mxu0 }
 0x757   :  { %v2160_v28 = vpop.f32.mrf.mxu0 }
 0x80c   :  { %v683_v29 = vpop.f32.mrf.mxu1 }
 0x80d   :  { %v734_v33 = vadd.f32 %v733_v25, %v683_v29 }
 0x80e   :  { %v2153_v34 = vpop.f32.mrf.mxu1 }
 0x80f   :  { %v747_v35 = vadd.f32 %v1957_v30, %v734_v33 }
 0x810   :  { %v686_v36 = vpop.f32.mrf.mxu1 }
 0x811   :  { %v737_v37 = vadd.f32 %v736_v27, %v686_v36  ;;  %v749_v39 = vadd.f32 %v747_v35, %v2502_v31 }
 0x812   :  { %v2154_v40 = vpop.f32.mrf.mxu1 }
 0x813   :  { %v748_v41 = vadd.f32 %v1957_v30, %v737_v37  ;;  %v753_v43 = vsel %vm61_vm0, %v749_v39, 0.0 }
 0x814   :  { %754 = vadd.xlane.f32.xlu1 %v753_v43 }
 0x815   :  { %v750_v44 = vadd.f32 %v748_v41, %v2504_v32  ;;  %v2281_v32 = vld [vmem:[%s2858_s10 + $0x8] sm:$0xff]  }
 0x816   :  { %2162 = vmatpush3.bf16.msra.mxu1 %v2281_v32 }
 0x817   :  { %v756_v45 = vsel %vm61_vm0, %v750_v44, 0.0  ;;  %2163 = vmatprep.subr.bf16.mxu1 %v2379_v15 }
 0x818   :  { %757 = vadd.xlane.f32.xlu0 %v756_v45 }
 0x81a   :  { %2164 = vmatpush3.bf16.msra.mxu1 %v2282_v57 }
 0x81b   :  { %2181 = vmatprep.subr.bf16.mxu1 %v2379_v15 }
 0x89d   :  { %v755_v46 = vpop.xlane.xlu1 %754 }
 0x89e   :  { %v759_v47 = vmul.f32 0.03125, %v755_v46 }
 0x8a0   :  { %v761_v48 = vsub.f32 %v749_v39, %v759_v47 }
 0x8a1   :  { %v758_v49 = vpop.xlane.xlu0 %757 }
 0x8a2   :  { %v760_v50 = vmul.f32 0.03125, %v758_v49  ;;  %v763_v52 = vmul.f32 %v761_v48, %v761_v48 }
 0x8a4   :  { %v762_v53 = vsub.f32 %v750_v44, %v760_v50  ;;  %v765_v54 = vsel %vm61_vm0, %v763_v52, 0.0  ;;  %v1964_v44 = vld [vmem:[%s2861_s13] ss:$0 sm:$0xff] }
 0x8a5   :  { %766 = vadd.xlane.f32.xlu0 %v765_v54 }
 0x8a6   :  { %v764_v31 = vmul.f32 %v762_v53, %v762_v53 }
 0x8a8   :  { %v768_v56 = vsel %vm61_vm0, %v764_v31, 0.0 }
 0x8a9   :  { %769 = vadd.xlane.f32.xlu1 %v768_v56 }
 0x92e   :  { %v767_v58 = vpop.xlane.xlu0 %766 }
 0x92f   :  { %v771_v59 = vmul.f32 0.03125, %v767_v58 }
 0x931   :  { %v773_v60 = vadd.f32 1e-12, %v771_v59 }
 0x932   :  { %v770_v61 = vpop.xlane.xlu1 %769 }
 0x933   :  { %2317 = vrsqrt.f32 %v773_v60  ;;  %v772_v62 = vmul.f32 0.03125, %v770_v61 }
 0x935   :  { %v774_v63 = vadd.f32 1e-12, %v772_v62 }
 0x937   :  { %2319 = vrsqrt.f32 %v774_v63 }
 0x940   :  { %v2318_v0 = vpop.eup %2317 }
 0x941   :  { %v777_v1 = vmul.f32 %v2318_v0, %v761_v48 }
 0x943   :  { %v785_v4 = vmul.f32 %v1958_v2, %v777_v1  ;;  %v2287_v1 = vld [vmem:[%s2852_s4 + $0x18] sm:$0xff]  }
 0x944   :  { %v2320_v3 = vpop.eup %2319 }
 0x945   :  { %v778_v42 = vmul.f32 %v2320_v3, %v762_v53  ;;  %v793_v7 = vadd.f32 %v1959_v5, %v785_v4 }
 0x947   :  { %v786_v6 = vmul.f32 %v1958_v2, %v778_v42  ;;  %v2288_v2 = vld [vmem:[%s2852_s4 + $0x10] sm:$0xff]  }
 0x949   :  { %v794_v8 = vadd.f32 %v1959_v5, %v786_v6 }
 0x94b   :  { %v795_v9 = vpack.c.bf16 %v794_v8, %v793_v7 }
 0x94d   :  { %2166 = vmatmul.mubr.msk.bf16.vlgmr.msra.gmra.mxu1 %vm61_vm0, %v795_v9 }
 0x94e   :  { %2185 = vmatprep.mubr.msk.bf16.mxu1 %vm2380_vm1, %v2379_v15  ;;  %2182 = vmatpush3.bf16.msra.mxu1 %v2287_v1 }
 0x94f   :  { %2183 = vmatprep.subr.bf16.mxu1 %v2379_v15 }
 0x952   :  { %2184 = vmatpush3.bf16.msra.mxu1 %v2288_v2 }
 0x953   :  { %2189 = vmatprep.subr.bf16.mxu1 %v2379_v15 }
 0xa0d   :  { %v856_v14 = vpop.f32.mrf.mxu1 }
 0xa0e   :  { %v857_v16 = vadd.f32 %v1960_v13, %v856_v14 }
 0xa0f   :  { %v2167_v17 = vpop.f32.mrf.mxu1 }
 0xa10   :  { %v865_v18 = vmul.f32 0.044715, %v857_v16  ;;  %v863_v36 = vmul.f32 0.5, %v857_v16 }
 0xa11   :  { %v859_v19 = vpop.f32.mrf.mxu1 }
 0xa12   :  { %v867_v20 = vmul.f32 %v865_v18, %v857_v16  ;;  %v860_v21 = vadd.f32 %v1960_v13, %v859_v19  ;;  %v1971_v13 = vld [vmem:[%s2863_s15] ss:$0 sm:$0xff]  ;;  %v1977_v19 = vld [vmem:[%s2853_s5 + $0x1] ss:$0 sm:$0xff] }
 0xa13   :  { %v2168_v22 = vpop.f32.mrf.mxu1 }
 0xa14   :  { %v869_v23 = vmul.f32 %v867_v20, %v857_v16  ;;  %v866_v24 = vmul.f32 0.044715, %v860_v21  ;;  %v864_v37 = vmul.f32 0.5, %v860_v21 }
 0xa16   :  { %v871_v25 = vadd.f32 %v869_v23, %v857_v16  ;;  %v868_v26 = vmul.f32 %v866_v24, %v860_v21 }
 0xa18   :  { %v873_v27 = vmul.f32 0.7978846, %v871_v25  ;;  %v870_v28 = vmul.f32 %v868_v26, %v860_v21 }
 0xa1a   :  { %2321 = vtanh.f32 %v873_v27  ;;  %v872_v29 = vadd.f32 %v870_v28, %v860_v21 }
 0xa1c   :  { %v874_v30 = vmul.f32 0.7978846, %v872_v29 }
 0xa1e   :  { %2323 = vtanh.f32 %v874_v30 }
 0xa27   :  { %v2322_v33 = vpop.eup %2321 }
 0xa28   :  { %v877_v34 = vadd.f32 1.0, %v2322_v33 }
 0xa2a   :  { %v879_v40 = vmul.f32 %v877_v34, %v863_v36 }
 0xa2b   :  { %v2324_v35 = vpop.eup %2323 }
 0xa2c   :  { %v878_v39 = vadd.f32 1.0, %v2324_v35 }
 0xa2e   :  { %v880_v41 = vmul.f32 %v878_v39, %v864_v37 }
 0xa30   :  { %v881_v43 = vpack.c.bf16 %v880_v41, %v879_v40 }
 0xa32   :  { %2178 = vmatmul.mubr.msk.bf16.vlgmr.msra.gmra.mxu0 %vm921_vm5, %v881_v43 }
 0xa33   :  { %2197 = vmatprep.mubr.msk.bf16.mxu0 %vm2380_vm1, %v2379_v15 }
 0xaf2   :  { %v959_v45 = vpop.f32.mrf.mxu0 }
 0xaf3   :  { %v960_v46 = vadd.f32 %v1964_v44, %v959_v45 }
 0xaf4   :  { %v2179_v47 = vpop.f32.mrf.mxu0 }
 0xaf5   :  { %v966_v48 = vadd.f32 %v960_v46, %v793_v7 }
 0xaf6   :  { %v962_v49 = vpop.f32.mrf.mxu0 }
 0xaf7   :  { %v963_v50 = vadd.f32 %v1964_v44, %v962_v49  ;;  %v970_v52 = vsel %vm61_vm0, %v966_v48, 0.0 }
 0xaf8   :  { %971 = vadd.xlane.f32.xlu0 %v970_v52  ;;  %v2180_v53 = vpop.f32.mrf.mxu0 }
 0xaf9   :  { %v967_v54 = vadd.f32 %v963_v50, %v794_v8 }
 0xafb   :  { %v973_v31 = vsel %vm61_vm0, %v967_v54, 0.0 }
 0xafc   :  { %974 = vadd.xlane.f32.xlu1 %v973_v31 }
 0xb81   :  { %v972_v56 = vpop.xlane.xlu0 %971 }
 0xb82   :  { %v976_v32 = vmul.f32 0.03125, %v972_v56 }
 0xb84   :  { %v978_v57 = vsub.f32 %v966_v48, %v976_v32 }
 0xb85   :  { %v975_v58 = vpop.xlane.xlu1 %974 }
 0xb86   :  { %v977_v59 = vmul.f32 0.03125, %v975_v58  ;;  %v980_v60 = vmul.f32 %v978_v57, %v978_v57 }
 0xb88   :  { %v979_v61 = vsub.f32 %v967_v54, %v977_v59  ;;  %v982_v62 = vsel %vm61_vm0, %v980_v60, 0.0 }
 0xb89   :  { %983 = vadd.xlane.f32.xlu0 %v982_v62 }
 0xb8a   :  { %v981_v63 = vmul.f32 %v979_v61, %v979_v61 }
 0xb8c   :  { %v985_v0 = vsel %vm61_vm0, %v981_v63, 0.0 }
 0xb8d   :  { %986 = vadd.xlane.f32.xlu1 %v985_v0 }
 0xc12   :  { %v984_v3 = vpop.xlane.xlu0 %983 }
 0xc13   :  { %v988_v42 = vmul.f32 0.03125, %v984_v3 }
 0xc15   :  { %v990_v4 = vadd.f32 1e-12, %v988_v42 }
 0xc16   :  { %v987_v5 = vpop.xlane.xlu1 %986 }
 0xc17   :  { %2325 = vrsqrt.f32 %v990_v4  ;;  %v989_v6 = vmul.f32 0.03125, %v987_v5 }
 0xc19   :  { %v991_v7 = vadd.f32 1e-12, %v989_v6 }
 0xc1b   :  { %2327 = vrsqrt.f32 %v991_v7 }
 0xc24   :  { %v2326_v8 = vpop.eup %2325 }
 0xc25   :  { %v994_v9 = vmul.f32 %v2326_v8, %v978_v57 }
 0xc27   :  { %v1002_v38 = vmul.f32 %v1970_v10, %v994_v9 }
 0xc28   :  { %v2328_v11 = vpop.eup %2327 }
 0xc29   :  { %v995_v12 = vmul.f32 %v2328_v11, %v979_v61  ;;  %v2687_v16 = vadd.f32 %v1971_v13, %v1002_v38 }
 0xc2b   :  { %v1003_v14 = vmul.f32 %v1970_v10, %v995_v12 }
 0xc2d   :  { %v2689_v17 = vadd.f32 %v1971_v13, %v1003_v14 }
 0xc2f   :  { %v1012_v18 = vpack.c.bf16 %v2689_v17, %v2687_v16 }
 0xc31   :  { %2186 = vmatmul.mubr.msk.bf16.vlgmr.msra.gmra.mxu1 %vm61_vm0, %v1012_v18 }
 0xc32   :  { %2191 = vmatprep.mubr.msk.bf16.mxu1 %vm2380_vm1, %v2379_v15 }
 0xcf1   :  { %v1075_v20 = vpop.f32.mrf.mxu1 }
 0xcf2   :  { %v1076_v21 = vadd.f32 %v1977_v19, %v1075_v20 }
 0xcf3   :  { %v2187_v22 = vpop.f32.mrf.mxu1 }
 0xcf4   :  { %v2699_v23 = vpack.c.bf16 %v1076_v21, %v1076_v21  ;;  %v1082_v30 = vmul.f32 0.25, %v1076_v21 }
 0xcf5   :  { %v1078_v24 = vpop.f32.mrf.mxu1 }
 0xcf6   :  { %v1079_v25 = vadd.f32 %v1977_v19, %v1078_v24  ;;  %1089 = vrot.lane.b32.xlu0 %v2699_v23, %s2381_s3  ;;  %v1084_v35 = vpack.c.bf16 %v1082_v30, %v1082_v30 }
 0xcf7   :  { %v2188_v26 = vpop.f32.mrf.mxu1 }
 0xcf8   :  { %v2703_v27 = vpack.c.bf16 %v1079_v25, %v1079_v25  ;;  %v1083_v36 = vmul.f32 0.25, %v1079_v25 }
 0xcfa   :  { %1138 = vrot.lane.b32.xlu1 %v2703_v27, %s2381_s3  ;;  %v1085_v37 = vpack.c.bf16 %v1083_v36, %v1083_v36 }
 0xd68   :  { %v1090_v28 = vpop.permute.xlu0 %1089 }
 0xd69   :  { %v1095_v29 = vsel %vm194_vm2, %v1090_v28, 0 }
 0xd6a   :  { %2190 = vmatpush3.bf16.xpose.msra.mxu1 %v1095_v29 }
 0xd6b   :  { %2201 = vmatprep.subr.bf16.mxu1 %v2379_v15 }
 0xd6c   :  { %v1139_v33 = vpop.permute.xlu1 %1138 }
 0xd6d   :  { %v1144_v34 = vsel %vm194_vm2, %v1139_v33, 0 }
 0xd6e   :  { %2196 = vmatpush3.bf16.xpose.msra.mxu0 %v1144_v34 }
 0xd6f   :  { %2207 = vmatprep.subr.bf16.mxu0 %v2379_v15 }
 0xd71   :  { %2192 = vmatmul.mubr.msk.bf16.vlgmr.msra.gmra.mxu1 %vm194_vm2, %v1084_v35 }
 0xd72   :  { %2203 = vmatprep.mubr.msk.bf16.mxu1 %vm2380_vm1, %v2379_v15 }
 0xd75   :  { %2198 = vmatmul.mubr.msk.bf16.vlgmr.msra.gmra.mxu0 %vm194_vm2, %v1085_v37 }
 0xd76   :  { %2209 = vmatprep.mubr.msk.bf16.mxu0 %vm2380_vm1, %v2379_v15 }
 0xe31   :  { %v1131_v39 = vpop.f32.mrf.mxu1 }
 0xe32   :  { %v1132_v40 = vadd.f32 %v2535_v51, %v1131_v39 }
 0xe33   :  { %v2193_v41 = vpop.f32.mrf.mxu1 }
 0xe34   :  { %v1186_v43 = vsel %vm290_vm3, %v1132_v40, -inf }
 0xe35   :  { %1187 = vmax.xlane.f32.xlu1 %v1186_v43  ;;  %v1134_v44 = vpop.f32.mrf.mxu1  ;;  %v1180_v45 = vpop.f32.mrf.mxu0 }
 0xe36   :  { %v1181_v46 = vadd.f32 %v2541_v55, %v1180_v45 }
 0xe37   :  { %v2194_v47 = vpop.f32.mrf.mxu1  ;;  %v2199_v48 = vpop.f32.mrf.mxu0 }
 0xe38   :  { %v1189_v49 = vsel %vm290_vm3, %v1181_v46, -inf }
 0xe39   :  { %1190 = vmax.xlane.f32.xlu0 %v1189_v49  ;;  %v1183_v50 = vpop.f32.mrf.mxu0 }
 0xe3b   :  { %v2200_v52 = vpop.f32.mrf.mxu0 }
 0xe46   :  { %1258 = vrot.lane.b32.xlu1 %v2703_v27, %s2382_s24 }
 0xe4a   :  { %1313 = vrot.lane.b32.xlu1 %v2699_v23, %s2383_s1 }
 0xebe   :  { %v1188_v53 = vpop.xlane.xlu1 %1187 }
 0xebf   :  { %v1192_v54 = vsub.f32 %v1132_v40, %v1188_v53 }
 0xec1   :  { %v1194_v31 = vmul.f32 1.442695, %v1192_v54 }
 0xec2   :  { %v1259_v56 = vpop.permute.xlu1 %1258  ;;  %v1191_v32 = vpop.xlane.xlu0 %1190 }
 0xec3   :  { %2329 = vpow2.f32 %v1194_v31  ;;  %v1264_v57 = vsel %vm320_vm4, %v1259_v56, 0  ;;  %v1193_v58 = vsub.f32 %v1181_v46, %v1191_v32 }
 0xec4   :  { %2208 = vmatpush3.bf16.msra.mxu0 %v1264_v57 }
 0xec5   :  { %v1196_v59 = vmul.f32 1.442695, %v1193_v58  ;;  %2219 = vmatprep.subr.bf16.mxu0 %v2379_v15 }
 0xec6   :  { %v1314_v0 = vpop.permute.xlu1 %1313 }
 0xec7   :  { %2331 = vpow2.f32 %v1196_v59  ;;  %v1319_v8 = vsel %vm194_vm2, %v1314_v0, 0 }
 0xed0   :  { %v2330_v60 = vpop.eup %2329 }
 0xed1   :  { %v1198_v61 = vsel %vm290_vm3, %v2330_v60, 0.0 }
 0xed2   :  { %1199 = vadd.xlane.f32.xlu0 %v1198_v61 }
 0xed4   :  { %v2332_v62 = vpop.eup %2331 }
 0xed5   :  { %v1201_v63 = vsel %vm290_vm3, %v2332_v62, 0.0 }
 0xed6   :  { %1202 = vadd.xlane.f32.xlu1 %v1201_v63  ;;  %v2290_v63 = vld [vmem:[%s2854_s6 + $0x18] sm:$0xff]  }
 0xee7   :  { %1364 = vrot.lane.b32.xlu1 %v2703_v27, %s2383_s1 }
 0xee8   :  { %1210 = vrot.lane.b32.xlu0 %v2699_v23, %s2382_s24  ;;  %s2386_s24 = smov [#allocation2]  }
 0xee9   :  { %s1929_s1 = sshll.u32 %s2386_s24, 4  ;;  %s1930_s1 = int_to_ptr.vmem [resolvable:$true] %s1929_s1 }
 0xeea   :  { %p2362_p1 = scmp.lt.s32.totalorder %s1930_s1, %s1930_s1 }
 0xeeb   :  { %1362 = vrot.lane.b32.xlu1 %v1085_v37, %s2384_s25 }
 0xeec   :  { %1311 = vrot.lane.b32.xlu0 %v1084_v35, %s2384_s25 }
 0xf5b   :  { %v1200_v1 = vpop.xlane.xlu0 %1199 }
 0xf5c   :  { %2333 = vrcp.f32 %v1200_v1 }
 0xf5f   :  { %v1203_v2 = vpop.xlane.xlu1 %1202  ;;  %v1211_v3 = vpop.permute.xlu0 %1210 }
 0xf60   :  { %2335 = vrcp.f32 %v1203_v2  ;;  %v1216_v42 = vsel %vm320_vm4, %v1211_v3, 0 }
 0xf61   :  { %2202 = vmatpush3.bf16.msra.mxu1 %v1216_v42 }
 0xf62   :  { %2213 = vmatprep.subr.bf16.mxu1 %v2379_v15 }
 0xf63   :  { %v1365_v10 = vpop.permute.xlu1 %1364  ;;  %v1312_v38 = vpop.permute.xlu0 %1311 }
 0xf64   :  { %v1370_v12 = vsel %vm194_vm2, %v1365_v10, 0 }
 0xf67   :  { %v1363_v13 = vpop.permute.xlu1 %1362 }
 0xf69   :  { %v2334_v4 = vpop.eup %2333 }
 0xf6a   :  { %v1206_v5 = vmul.f32 %v2334_v4, %v2330_v60 }
 0xf6c   :  { %v1208_v6 = vpack.c.bf16 %v1206_v5, %v1206_v5 }
 0xf6d   :  { %v2336_v7 = vpop.eup %2335 }
 0xf6e   :  { %2204 = vmatmul.mubr.msk.bf16.vlgmr.msra.gmra.mxu1 %vm290_vm3, %v1208_v6  ;;  %v1207_v9 = vmul.f32 %v2336_v7, %v2332_v62 }
 0xf6f   :  { %2214 = vmatpush3.bf16.xpose.msra.mxu1 %v1319_v8  ;;  %2215 = vmatprep.mubr.msk.bf16.mxu1 %vm2380_vm1, %v2379_v15 }
 0xf70   :  { %v1209_v11 = vpack.c.bf16 %v1207_v9, %v1207_v9  ;;  %2225 = vmatprep.subr.bf16.mxu1 %v2379_v15 }
 0xf72   :  { %2210 = vmatmul.mubr.msk.bf16.vlgmr.msra.gmra.mxu0 %vm290_vm3, %v1209_v11 }
 0xf73   :  { %2220 = vmatpush3.bf16.xpose.msra.mxu0 %v1370_v12  ;;  %2221 = vmatprep.mubr.msk.bf16.mxu0 %vm2380_vm1, %v2379_v15 }
 0xf74   :  { %2231 = vmatprep.subr.bf16.mxu0 %v2379_v15 }
 0xf76   :  { %2216 = vmatmul.mubr.msk.bf16.vlgmr.msra.gmra.mxu1 %vm194_vm2, %v1312_v38  ;;  %v1998_v38 = vld [vmem:[%s2855_s7 + $0x1] ss:$0 sm:$0xff] }
 0xf77   :  { %2227 = vmatprep.mubr.msk.bf16.mxu1 %vm2380_vm1, %v2379_v15 }
 0xf7a   :  { %2222 = vmatmul.mubr.msk.bf16.vlgmr.msra.gmra.mxu0 %vm194_vm2, %v1363_v13 }
 0xf7b   :  { %2233 = vmatprep.mubr.msk.bf16.mxu0 %vm2380_vm1, %v2379_v15 }
0x102e   :  { %v2753_v14 = vpop.f32.mrf.mxu1 }
0x1030   :  { %v2205_v18 = vpop.f32.mrf.mxu1 }
0x1032   :  { %v1255_v19 = vpop.f32.mrf.mxu1  ;;  %v1300_v20 = vpop.f32.mrf.mxu0 }
0x1033   :  { %v1306_v21 = vpack.c.bf16 %v1300_v20, %v2753_v14 }
0x1034   :  { %v2206_v22 = vpop.f32.mrf.mxu1  ;;  %v2211_v24 = vpop.f32.mrf.mxu0 }
0x1036   :  { %v1303_v25 = vpop.f32.mrf.mxu0  ;;  %v1355_v26 = vpop.f32.mrf.mxu1 }
0x1037   :  { %v1356_v28 = vadd.f32 %v2535_v51, %v1355_v26 }
0x1038   :  { %v2212_v29 = vpop.f32.mrf.mxu0  ;;  %v2217_v30 = vpop.f32.mrf.mxu1 }
0x1039   :  { %v1412_v33 = vsel %vm290_vm3, %v1356_v28, -inf }
0x103a   :  { %1413 = vmax.xlane.f32.xlu0 %v1412_v33  ;;  %v1358_v34 = vpop.f32.mrf.mxu1  ;;  %v1406_v35 = vpop.f32.mrf.mxu0 }
0x103b   :  { %v1407_v36 = vadd.f32 %v2541_v55, %v1406_v35 }
0x103c   :  { %v2218_v37 = vpop.f32.mrf.mxu1  ;;  %v2223_v39 = vpop.f32.mrf.mxu0 }
0x103d   :  { %v1415_v40 = vsel %vm290_vm3, %v1407_v36, -inf }
0x103e   :  { %1416 = vmax.xlane.f32.xlu1 %v1415_v40  ;;  %v1409_v41 = vpop.f32.mrf.mxu0 }
0x103f   :  { %v2292_v41 = vld [vmem:[%s2858_s10 + $0x10] sm:$0xff]  }
0x1040   :  { %v2224_v43 = vpop.f32.mrf.mxu0 }
0x104f   :  { %1484 = vrot.lane.b32.xlu1 %v2703_v27, %s2385_s26 }
0x10c3   :  { %v1414_v51 = vpop.xlane.xlu0 %1413 }
0x10c4   :  { %v1418_v44 = vsub.f32 %v1356_v28, %v1414_v51 }
0x10c6   :  { %v1420_v45 = vmul.f32 1.442695, %v1418_v44 }
0x10c7   :  { %v1417_v46 = vpop.xlane.xlu1 %1416 }
0x10c8   :  { %2337 = vpow2.f32 %v1420_v45  ;;  %v1419_v47 = vsub.f32 %v1407_v36, %v1417_v46 }
0x10ca   :  { %v1422_v48 = vmul.f32 1.442695, %v1419_v47 }
0x10cb   :  { %v1485_v49 = vpop.permute.xlu1 %1484 }
0x10cc   :  { %2339 = vpow2.f32 %v1422_v48  ;;  %v1490_v55 = vsel %vm320_vm4, %v1485_v49, 0 }
0x10cd   :  { %2232 = vmatpush3.bf16.msra.mxu0 %v1490_v55  ;;  %v2001_v55 = vld [vmem:[%s2856_s8 + $0x1] ss:$0 sm:$0xff] }
0x10ce   :  { %2243 = vmatprep.subr.bf16.mxu0 %v2379_v15 }
0x10d5   :  { %v2338_v50 = vpop.eup %2337 }
0x10d6   :  { %v1424_v52 = vsel %vm290_vm3, %v2338_v50, 0.0 }
0x10d7   :  { %1425 = vadd.xlane.f32.xlu0 %v1424_v52 }
0x10d9   :  { %v2340_v53 = vpop.eup %2339 }
0x10da   :  { %v1427_v27 = vsel %vm290_vm3, %v2340_v53, 0.0 }
0x10db   :  { %1428 = vadd.xlane.f32.xlu0 %v1427_v27  ;;  %v2002_v27 = vld [vmem:[%s2857_s9 + $0x1] ss:$0 sm:$0xff] }
0x10f1   :  { %1436 = vrot.lane.b32.xlu0 %v2699_v23, %s2385_s26  ;;  %v2289_v23 = vld [vmem:[%s2854_s6 + $0x10] sm:$0xff]   ;;  %s2357_s6 = scalar_lea.vmem %s1930_s1, 32 }
0x10f2   :  { %p2358_p0 = scmp.ne.s32.totalorder %s1930_s1, %s2357_s6  ;;  %p2363_p2 = scmp.lt.s32.totalorder %s2357_s6, %s2357_s6 }
0x10f4   :  { %p2364_p3 = por %p2363_p2, %p2362_p1 }
0x10f6   :  { %p2365_p4 = pnand %p2364_p3, %p2358_p0 }
0x1160   :  { %v1426_v54 = vpop.xlane.xlu0 %1425 }
0x1161   :  { %2341 = vrcp.f32 %v1426_v54 }
0x1164   :  { %v1429_v31 = vpop.xlane.xlu0 %1428 }
0x1165   :  { %2343 = vrcp.f32 %v1429_v31 }
0x1168   :  { %v1437_v56 = vpop.permute.xlu0 %1436 }
0x1169   :  { %v1442_v32 = vsel %vm320_vm4, %v1437_v56, 0 }
0x116a   :  { %2226 = vmatpush3.bf16.msra.mxu1 %v1442_v32 }
0x116b   :  { %2237 = vmatprep.subr.bf16.mxu1 %v2379_v15 }
0x116e   :  { %v2342_v57 = vpop.eup %2341 }
0x116f   :  { %v1432_v58 = vmul.f32 %v2342_v57, %v2338_v50  ;;  %v2293_v57 = vld [vmem:[%s2860_s12 + $0x38] sm:$0xff]  }
0x1171   :  { %v1434_v59 = vpack.c.bf16 %v1432_v58, %v1432_v58  ;;  %v2294_v58 = vld [vmem:[%s2860_s12 + $0x30] sm:$0xff]  }
0x1172   :  { %v2344_v60 = vpop.eup %2343 }
0x1173   :  { %2228 = vmatmul.mubr.msk.bf16.vlgmr.msra.gmra.mxu1 %vm290_vm3, %v1434_v59  ;;  %v1433_v61 = vmul.f32 %v2344_v60, %v2340_v53  ;;  %v2295_v59 = vld [vmem:[%s2860_s12 + $0x28] sm:$0xff]   ;;  %v2296_v60 = vld [vmem:[%s2860_s12 + $0x20] sm:$0xff]  }
0x1174   :  { %2239 = vmatprep.mubr.msk.bf16.mxu1 %vm2380_vm1, %v2379_v15  ;;  %2238 = vmatpush3.bf16.msra.mxu1 %v2290_v63 }
0x1175   :  { %v1435_v62 = vpack.c.bf16 %v1433_v61, %v1433_v61  ;;  %2249 = vmatprep.subr.bf16.mxu1 %v2379_v15  ;;  %v2008_v61 = vld [vmem:[%s2859_s11 + $0x1] ss:$0 sm:$0xff] }
0x1177   :  { %2234 = vmatmul.mubr.msk.bf16.vlgmr.msra.gmra.mxu0 %vm290_vm3, %v1435_v62 }
0x1178   :  { %2244 = vmatpush3.bf16.msra.mxu0 %v2289_v23  ;;  %2245 = vmatprep.mubr.msk.bf16.mxu0 %vm2380_vm1, %v2379_v15 }
0x1179   :  { %2257 = vmatprep.subr.bf16.mxu0 %v2379_v15 }
0x117f   :  { %2246 = vmatmul.mubr.msk.bf16.vlgmr.msra.gmra.mxu0 %vm194_vm2, %v1306_v21 }
0x1180   :  { %2265 = vmatprep.mubr.msk.bf16.mxu0 %vm2380_vm1, %v2379_v15  ;;  %2258 = vmatpush3.bf16.msra.mxu0 %v2293_v57  ;;  %v2030_v57 = vld [vmem:[%s2863_s15 + $0x1] ss:$0 sm:$0xff] }
0x1181   :  { %2259 = vmatprep.subr.bf16.mxu0 %v2379_v15 }
0x1184   :  { %2260 = vmatpush3.bf16.msra.mxu0 %v2294_v58 }
0x1185   :  { %2261 = vmatprep.subr.bf16.mxu0 %v2379_v15 }
0x1188   :  { %2262 = vmatpush3.bf16.msra.mxu0 %v2295_v59 }
0x1189   :  { %2263 = vmatprep.subr.bf16.mxu0 %v2379_v15 }
0x118c   :  { %2264 = vmatpush3.bf16.msra.mxu0 %v2296_v60 }
0x1233   :  { %v1478_v0 = vpop.f32.mrf.mxu1 }
0x1235   :  { %v2229_v1 = vpop.f32.mrf.mxu1 }
0x1237   :  { %v1481_v2 = vpop.f32.mrf.mxu1  ;;  %v1526_v3 = vpop.f32.mrf.mxu0 }
0x1238   :  { %v1532_v42 = vpack.c.bf16 %v1526_v3, %v1478_v0 }
0x1239   :  { %v2230_v4 = vpop.f32.mrf.mxu1  ;;  %v2235_v5 = vpop.f32.mrf.mxu0 }
0x123a   :  { %2240 = vmatmul.mubr.msk.bf16.vlgmr.msra.gmra.mxu1 %vm194_vm2, %v1532_v42 }
0x123b   :  { %v1529_v6 = vpop.f32.mrf.mxu0  ;;  %2253 = vmatprep.mubr.msk.bf16.mxu1 %vm2380_vm1, %v2379_v15 }
0x123d   :  { %v2236_v7 = vpop.f32.mrf.mxu0 }
0x123f   :  { %v1628_v8 = vpop.f32.mrf.mxu0 }
0x1241   :  { %v2247_v9 = vpop.f32.mrf.mxu0 }
0x1243   :  { %v1631_v10 = vpop.f32.mrf.mxu0 }
0x1245   :  { %v2248_v11 = vpop.f32.mrf.mxu0 }
0x12fa   :  { %v1578_v12 = vpop.f32.mrf.mxu1 }
0x12fb   :  { %v1629_v13 = vadd.f32 %v1628_v8, %v1578_v12 }
0x12fc   :  { %v2241_v14 = vpop.f32.mrf.mxu1 }
0x12fd   :  { %v1643_v18 = vadd.f32 %v1998_v38, %v1629_v13 }
0x12fe   :  { %v1581_v19 = vpop.f32.mrf.mxu1 }
0x12ff   :  { %v1632_v20 = vadd.f32 %v1631_v10, %v1581_v19  ;;  %v1645_v21 = vadd.f32 %v1643_v18, %v2687_v16 }
0x1300   :  { %v2242_v22 = vpop.f32.mrf.mxu1 }
0x1301   :  { %v1644_v24 = vadd.f32 %v1998_v38, %v1632_v20  ;;  %v1651_v25 = vsel %vm61_vm0, %v1645_v21, 0.0  ;;  %v2021_v22 = vld [vmem:[%s2861_s13 + $0x1] ss:$0 sm:$0xff] }
0x1302   :  { %1652 = vadd.xlane.f32.xlu1 %v1651_v25 }
0x1303   :  { %v1646_v26 = vadd.f32 %v1644_v24, %v2689_v17  ;;  %v2291_v17 = vld [vmem:[%s2858_s10 + $0x18] sm:$0xff]  }
0x1304   :  { %2250 = vmatpush3.bf16.msra.mxu1 %v2291_v17 }
0x1305   :  { %v1654_v28 = vsel %vm61_vm0, %v1646_v26, 0.0  ;;  %2251 = vmatprep.subr.bf16.mxu1 %v2379_v15 }
0x1306   :  { %1655 = vadd.xlane.f32.xlu0 %v1654_v28 }
0x1308   :  { %2252 = vmatpush3.bf16.msra.mxu1 %v2292_v41 }
0x138b   :  { %v1653_v29 = vpop.xlane.xlu1 %1652 }
0x138c   :  { %v1657_v30 = vmul.f32 0.03125, %v1653_v29 }
0x138e   :  { %v1659_v33 = vsub.f32 %v1645_v21, %v1657_v30 }
0x138f   :  { %v1656_v34 = vpop.xlane.xlu0 %1655 }
0x1390   :  { %v1658_v35 = vmul.f32 0.03125, %v1656_v34  ;;  %v1661_v36 = vmul.f32 %v1659_v33, %v1659_v33 }
0x1392   :  { %v1660_v37 = vsub.f32 %v1646_v26, %v1658_v35  ;;  %v1663_v39 = vsel %vm61_vm0, %v1661_v36, 0.0 }
0x1393   :  { %1664 = vadd.xlane.f32.xlu0 %v1663_v39 }
0x1394   :  { %v1662_v16 = vmul.f32 %v1660_v37, %v1660_v37 }
0x1396   :  { %v1666_v40 = vsel %vm61_vm0, %v1662_v16, 0.0 }
0x1397   :  { %1667 = vadd.xlane.f32.xlu1 %v1666_v40 }
0x141c   :  { %v1665_v43 = vpop.xlane.xlu0 %1664 }
0x141d   :  { %v1669_v51 = vmul.f32 0.03125, %v1665_v43 }
0x141f   :  { %v1671_v44 = vadd.f32 1e-12, %v1669_v51 }
0x1420   :  { %v1668_v45 = vpop.xlane.xlu1 %1667 }
0x1421   :  { %2345 = vrsqrt.f32 %v1671_v44  ;;  %v1670_v46 = vmul.f32 0.03125, %v1668_v45 }
0x1423   :  { %v1672_v47 = vadd.f32 1e-12, %v1670_v46 }
0x1425   :  { %2347 = vrsqrt.f32 %v1672_v47 }
0x142e   :  { %v2346_v48 = vpop.eup %2345 }
0x142f   :  { %v1675_v49 = vmul.f32 %v2346_v48, %v1659_v33 }
0x1431   :  { %v1683_v53 = vmul.f32 %v2001_v55, %v1675_v49 }
0x1432   :  { %v2348_v50 = vpop.eup %2347 }
0x1433   :  { %v1676_v52 = vmul.f32 %v2348_v50, %v1660_v37  ;;  %v1691_v31 = vadd.f32 %v2002_v27, %v1683_v53 }
0x1435   :  { %v1684_v54 = vmul.f32 %v2001_v55, %v1676_v52 }
0x1437   :  { %v1692_v56 = vadd.f32 %v2002_v27, %v1684_v54  ;;  %v2029_v54 = vld [vmem:[%s2862_s14 + $0x1] ss:$0 sm:$0xff] }
0x1439   :  { %v1693_v32 = vpack.c.bf16 %v1692_v56, %v1691_v31 }
0x143b   :  { %2254 = vmatmul.mubr.msk.bf16.vlgmr.msra.gmra.mxu1 %vm61_vm0, %v1693_v32 }
0x14fb   :  { %v1756_v23 = vpop.f32.mrf.mxu1 }
0x14fc   :  { %v1757_v62 = vadd.f32 %v2008_v61, %v1756_v23 }
0x14fd   :  { %v2255_v63 = vpop.f32.mrf.mxu1 }
0x14fe   :  { %v1765_v0 = vmul.f32 0.044715, %v1757_v62  ;;  %v1763_v13 = vmul.f32 0.5, %v1757_v62 }
0x14ff   :  { %v1759_v1 = vpop.f32.mrf.mxu1 }
0x1500   :  { %v1767_v2 = vmul.f32 %v1765_v0, %v1757_v62  ;;  %v1760_v3 = vadd.f32 %v2008_v61, %v1759_v1 }
0x1501   :  { %v2256_v42 = vpop.f32.mrf.mxu1 }
0x1502   :  { %v1769_v4 = vmul.f32 %v1767_v2, %v1757_v62  ;;  %v1766_v5 = vmul.f32 0.044715, %v1760_v3  ;;  %v1764_v14 = vmul.f32 0.5, %v1760_v3 }
0x1504   :  { %v1771_v6 = vadd.f32 %v1769_v4, %v1757_v62  ;;  %v1768_v7 = vmul.f32 %v1766_v5, %v1760_v3 }
0x1506   :  { %v1773_v8 = vmul.f32 0.7978846, %v1771_v6  ;;  %v1770_v9 = vmul.f32 %v1768_v7, %v1760_v3 }
0x1508   :  { %2349 = vtanh.f32 %v1773_v8  ;;  %v1772_v15 = vadd.f32 %v1770_v9, %v1760_v3 }
0x150a   :  { %v1774_v10 = vmul.f32 0.7978846, %v1772_v15 }
0x150c   :  { %2351 = vtanh.f32 %v1774_v10 }
0x1515   :  { %v2350_v11 = vpop.eup %2349 }
0x1516   :  { %v1777_v12 = vadd.f32 1.0, %v2350_v11 }
0x1518   :  { %v1779_v19 = vmul.f32 %v1777_v12, %v1763_v13 }
0x1519   :  { %v2352_v38 = vpop.eup %2351 }
0x151a   :  { %v1778_v18 = vadd.f32 1.0, %v2352_v38 }
0x151c   :  { %v1780_v20 = vmul.f32 %v1778_v18, %v1764_v14 }
0x151e   :  { %v1781_v21 = vpack.c.bf16 %v1780_v20, %v1779_v19 }
0x1520   :  { %2266 = vmatmul.mubr.msk.bf16.vlgmr.msra.gmra.mxu0 %vm921_vm5, %v1781_v21 }
0x15e0   :  { %v1860_v24 = vpop.f32.mrf.mxu0 }
0x15e1   :  { %v1861_v25 = vadd.f32 %v2021_v22, %v1860_v24 }
0x15e2   :  { %v2267_v26 = vpop.f32.mrf.mxu0 }
0x15e3   :  { %v1867_v28 = vadd.f32 %v1861_v25, %v1691_v31 }
0x15e4   :  { %v1863_v29 = vpop.f32.mrf.mxu0 }
0x15e5   :  { %v1864_v30 = vadd.f32 %v2021_v22, %v1863_v29  ;;  %v1873_v33 = vsel %vm61_vm0, %v1867_v28, 0.0 }
0x15e6   :  { %1874 = vadd.xlane.f32.xlu1 %v1873_v33  ;;  %v2268_v34 = vpop.f32.mrf.mxu0 }
0x15e7   :  { %v1868_v35 = vadd.f32 %v1864_v30, %v1692_v56 }
0x15e9   :  { %v1876_v36 = vsel %vm61_vm0, %v1868_v35, 0.0 }
0x15ea   :  { %1877 = vadd.xlane.f32.xlu0 %v1876_v36 }
0x166f   :  { %v1875_v37 = vpop.xlane.xlu1 %1874 }
0x1670   :  { %v1879_v39 = vmul.f32 0.03125, %v1875_v37 }
0x1672   :  { %v1881_v16 = vsub.f32 %v1867_v28, %v1879_v39 }
0x1673   :  { %v1878_v40 = vpop.xlane.xlu0 %1877 }
0x1674   :  { %v1880_v17 = vmul.f32 0.03125, %v1878_v40  ;;  %v1883_v41 = vmul.f32 %v1881_v16, %v1881_v16 }
0x1676   :  { %v1882_v43 = vsub.f32 %v1868_v35, %v1880_v17  ;;  %v1885_v51 = vsel %vm61_vm0, %v1883_v41, 0.0 }
0x1677   :  { %1886 = vadd.xlane.f32.xlu1 %v1885_v51 }
0x1678   :  { %v1884_v44 = vmul.f32 %v1882_v43, %v1882_v43 }
0x167a   :  { %v1888_v45 = vsel %vm61_vm0, %v1884_v44, 0.0 }
0x167b   :  { %1889 = vadd.xlane.f32.xlu0 %v1888_v45 }
0x1700   :  { %v1887_v46 = vpop.xlane.xlu1 %1886 }
0x1701   :  { %v1891_v47 = vmul.f32 0.03125, %v1887_v46 }
0x1703   :  { %v1893_v48 = vadd.f32 1e-12, %v1891_v47 }
0x1704   :  { %v1890_v49 = vpop.xlane.xlu0 %1889 }
0x1705   :  { %2353 = vrsqrt.f32 %v1893_v48  ;;  %v1892_v55 = vmul.f32 0.03125, %v1890_v49 }
0x1707   :  { %v1894_v50 = vadd.f32 1e-12, %v1892_v55 }
0x1709   :  { %2355 = vrsqrt.f32 %v1894_v50 }
0x1712   :  { %v2354_v52 = vpop.eup %2353 }
0x1713   :  { %v1897_v53 = vmul.f32 %v2354_v52, %v1881_v16 }
0x1715   :  { %v1905_v56 = vmul.f32 %v2029_v54, %v1897_v53 }
0x1716   :  { %v2356_v27 = vpop.eup %2355 }
0x1717   :  { %v1898_v31 = vmul.f32 %v2356_v27, %v1882_v43  ;;  %v1913_v59 = vadd.f32 %v2030_v57, %v1905_v56 }
0x1719   :  { %v1906_v32 = vmul.f32 %v2029_v54, %v1898_v31 }
0x171b   :  { %v1914_v58 = vadd.f32 %v2030_v57, %v1906_v32 }
0x171d   :  { %v1917_v60 = vrot.slane %v1914_v58, 7 }
0x171f   :  { %v1919_v61 = vsel %vm1918_vm6, %v1917_v60, %v1913_v59 }
0x1720   :  { %1922 = vst.msk [vmem:[#allocation2] sm:$0x3] %vm1921_vm7, %v1919_v61 }
0x1721   :  { %2368 = shalt.err (!%p2365_p4)
}
0x1722   :  { %1932 = dma.vmem_to_hbm [thread:$0]  %s1930_s1, 32, %s2864_s16, [#allocation3]  }
0x1723   :  { %2377 = dma.done.wait [#allocation3], 32  }
0x1724   :  { %2378 = vsyncadd [#allocation3], 4294967264 }
0x1725   :  { %1936 = vsyncpa [#allocation3], 1 }

</bundles_post_ra>
